<compile_context>
chip_gen: v7x
topology: tpu7x:2x2x1
jax: 0.10.0
libtpu: 0.0.40
codegen_flags: <defaults>
</compile_context>

<pallas_src>
import jax
import jax.numpy as jnp
from jax.experimental import pallas as pl
from jax.experimental.pallas import tpu as pltpu

EPS = 1e-5  # GroupNorm default eps


def _round_up(x, m):
    return ((x + m - 1) // m) * m


def _gn_relu(y, gamma, beta):
    """GroupNorm(1 group) over the channel axis + affine + ReLU, fused stats."""
    n = y.shape[-1]
    s1 = jnp.sum(y, axis=-1, keepdims=True)
    s2 = jnp.sum(y * y, axis=-1, keepdims=True)
    mu = s1 * (1.0 / n)
    var = jnp.maximum(s2 * (1.0 / n) - mu * mu, 0.0)   # biased variance (GN)
    yn = (y - mu) * jax.lax.rsqrt(var + EPS)
    return jnp.maximum(yn * gamma + beta, 0.0)


def _attdest_kernel(dist_ref, agts_ref, rep_ref, w_ref, pv_ref, out_ref):
    n_agt = out_ref.shape[1]

    # Packed per-channel parameter rows: [w1x, w1y, b1, g2, be2, g3, be3, 0].
    w1x = pv_ref[0:1, :]
    w1y = pv_ref[1:2, :]
    b1 = pv_ref[2:3, :]
    g2 = pv_ref[3:4, :]
    be2 = pv_ref[4:5, :]
    g3 = pv_ref[5:6, :]
    be3 = pv_ref[6:7, :]

    # ---- Linear(2, n_agt) + bias -> ReLU as two VPU broadcast FMAs ----
    dx = dist_ref[:, 0:1]                                    # (tm, 1)
    dy = dist_ref[:, 1:2]
    h = jnp.maximum(dx * w1x + dy * w1y + b1, 0.0)           # (tm, n_agt)

    # ---- Linear(n_agt, n_agt, bias=False) -> GroupNorm(1) -> ReLU ----
    h = jnp.dot(h, w_ref[0:n_agt, :], preferred_element_type=jnp.float32)
    h = _gn_relu(h, g2, be2)

    # ---- cat([h, agts_rep], 1) @ W3.T == h @ W3d + rep @ (agts_blk @ W3a) ----
    # rep is a constant 0/1 (tm, na) matrix with exactly one 1 per row, so the
    # in-kernel replication of the per-agent projection is numerically exact.
    a_proj = jnp.dot(agts_ref[...], w_ref[2 * n_agt:3 * n_agt, :],
                     preferred_element_type=jnp.float32)      # (na, n_agt)
    y = (jnp.dot(h, w_ref[n_agt:2 * n_agt, :], preferred_element_type=jnp.float32)
         + jnp.dot(rep_ref[...], a_proj, preferred_element_type=jnp.float32))
    out_ref[...] = _gn_relu(y, g3, be3)


def att_dest_pallas(agts, agt_ctrs, dest_ctrs, params, *, na=128):
    """agts: (N, n_agt), agt_ctrs: (N, 2), dest_ctrs: (N, num_mods, 2).

    `na` = agents per grid step (row tile is na * num_mods expanded rows).
    """
    (w1_t, b1, w2_t, g2, be2, w3d_t, w3a_t, g3, be3) = params
    N, n_agt = agts.shape
    num_mods = dest_ctrs.shape[1]
    M = N * num_mods
    f32 = jnp.float32

    # Agent-block tiling (row tile of the expanded problem = na * num_mods).
    na = min(na, _round_up(N, 8))
    na = _round_up(na, 8)
    tm = na * num_mods
    Np = _round_up(N, na)
    Mp = Np * num_mods
    grid = Np // na

    agts_p = agts.astype(f32)
    if Np != N:
        agts_p = jnp.pad(agts_p, ((0, Np - N), (0, 0)))

    # Tiny (M, 2) host-side subtraction; ~2 floats/row vs n_agt floats/row of output.
    dist = (agt_ctrs[:, None, :] - dest_ctrs).reshape(M, 2).astype(f32)
    if Mp != M:
        dist = jnp.pad(dist, ((0, Mp - M), (0, 0)))

    # Constant replication operator: row r selects agent r // num_mods.
    rep = (jnp.arange(tm)[:, None] // num_mods
           == jnp.arange(na)[None, :]).astype(f32)            # (tm, na)

    # Pack the three square weights and the seven per-channel rows.
    w_all = jnp.concatenate([w2_t, w3d_t, w3a_t], axis=0).astype(f32)   # (3n, n)
    pvec = jnp.concatenate(
        [w1_t, b1, g2, be2, g3, be3, jnp.zeros((1, n_agt), f32)], axis=0
    ).astype(f32)                                                        # (8, n)

    full = lambda i: (0, 0)
    out = pl.pallas_call(
        _attdest_kernel,
        out_shape=jax.ShapeDtypeStruct((Mp, n_agt), f32),
        grid_spec=pltpu.PrefetchScalarGridSpec(
            num_scalar_prefetch=0,
            grid=(grid,),
            in_specs=[
                pl.BlockSpec((tm, 2), lambda i: (i, 0)),          # dist rows
                pl.BlockSpec((na, n_agt), lambda i: (i, 0)),      # agts rows (not repeated)
                pl.BlockSpec((tm, na), full),                     # replication matrix
                pl.BlockSpec((3 * n_agt, n_agt), full),           # [W2^T; W3d^T; W3a^T]
                pl.BlockSpec((8, n_agt), full),                   # packed channel params
            ],
            out_specs=pl.BlockSpec((tm, n_agt), lambda i: (i, 0)),
        ),
        compiler_params=pltpu.CompilerParams(
            dimension_semantics=("parallel",)),
    )(dist, agts_p, rep, w_all, pvec)
    return out[:M]


def att_dest_reference(agts, agt_ctrs, dest_ctrs, params):
    """Pure-JAX reference with identical semantics, for verification."""
    (w1_t, b1, w2_t, g2, be2, w3d_t, w3a_t, g3, be3) = params
    N, n_agt = agts.shape
    num_mods = dest_ctrs.shape[1]
    dist = (agt_ctrs[:, None, :] - dest_ctrs).reshape(-1, 2)
    h = jnp.maximum(dist @ w1_t + b1, 0.0)
    h = h @ w2_t
    mu = h.mean(-1, keepdims=True)
    var = ((h - mu) ** 2).mean(-1, keepdims=True)
    h = jnp.maximum((h - mu) / jnp.sqrt(var + EPS) * g2 + be2, 0.0)
    agts_rep = jnp.repeat(agts, num_mods, axis=0)
    y = h @ w3d_t + agts_rep @ w3a_t
    mu = y.mean(-1, keepdims=True)
    var = ((y - mu) ** 2).mean(-1, keepdims=True)
    return jnp.maximum((y - mu) / jnp.sqrt(var + EPS) * g3 + be3, 0.0)


def init_params(key, n_agt):
    """Deterministic synthetic parameters matching the module's shapes."""
    ks = jax.random.split(key, 8)
    w1 = jax.random.normal(ks[0], (n_agt, 2), jnp.float32) * 0.5          # nn.Linear(2, n_agt).weight
    b1 = jax.random.normal(ks[1], (n_agt,), jnp.float32) * 0.1            # .bias
    w2 = jax.random.normal(ks[2], (n_agt, n_agt), jnp.float32) * 0.2      # Linear(n_agt, n_agt, bias=False)
    g2 = 1.0 + 0.1 * jax.random.normal(ks[3], (n_agt,), jnp.float32)      # GroupNorm(1) weight
    be2 = 0.1 * jax.random.normal(ks[4], (n_agt,), jnp.float32)           # GroupNorm(1) bias
    w3 = jax.random.normal(ks[5], (n_agt, 2 * n_agt), jnp.float32) * 0.2  # Linear(2*n_agt, n_agt, bias=False)
    g3 = 1.0 + 0.1 * jax.random.normal(ks[6], (n_agt,), jnp.float32)
    be3 = 0.1 * jax.random.normal(ks[7], (n_agt,), jnp.float32)
    # pre-transpose / split for the kernel
    return (w1.T, b1[None, :], w2.T, g2[None, :], be2[None, :],
            w3[:, :n_agt].T, w3[:, n_agt:].T, g3[None, :], be3[None, :])


if __name__ == "__main__":
    n_agt = 128     # LaneGCN hidden width; keeps the lane axis dense (multiple of 128)
    N = 45          # agents (not a multiple of the block -> exercises padding)
    num_mods = 6    # LaneGCN default number of modes

    key = jax.random.PRNGKey(0)
    k_agts, k_ctrs, k_dest, k_par = jax.random.split(key, 4)
    agts = jax.random.normal(k_agts, (N, n_agt), jnp.float32)
    agt_ctrs = jax.random.normal(k_ctrs, (N, 2), jnp.float32) * 10.0
    dest_ctrs = jax.random.normal(k_dest, (N, num_mods, 2), jnp.float32) * 10.0
    params = init_params(k_par, n_agt)

    # small na so the demo runs a multi-step grid; production default is na=128.
    out = att_dest_pallas(agts, agt_ctrs, dest_ctrs, params, na=16)
    out = jax.block_until_ready(out)

    ref = att_dest_reference(agts, agt_ctrs, dest_ctrs, params)
    assert out.shape == (N * num_mods, n_agt)
    max_err = jnp.max(jnp.abs(out - ref))
    assert jnp.allclose(out, ref, atol=5e-4, rtol=5e-4), f"mismatch vs reference (max abs err {max_err})"
    print("KERNEL_OK")
</pallas_src>

<mosaic_0001>
module attributes {stable_mosaic.version = 11 : i64} {
  func.func @_attdest_kernel(%arg0: i32, %arg1: memref<96x2xf32, #tpu.memory_space<vmem>>, %arg2: memref<16x128xf32, #tpu.memory_space<vmem>>, %arg3: memref<96x16xf32, #tpu.memory_space<vmem>>, %arg4: memref<384x128xf32, #tpu.memory_space<vmem>>, %arg5: memref<8x128xf32, #tpu.memory_space<vmem>>, %arg6: memref<96x128xf32, #tpu.memory_space<vmem>>) attributes {dimension_semantics = [#tpu.dimension_semantics<parallel>], iteration_bounds = array<i64: 3>, scalar_prefetch = 0 : i64, scratch_operands = 0 : i64, tpu.core_type = #tpu.core_type<tc>, window_params = [{transform_indices = @transform_0, window_bounds = array<i64: 96, 2>}, {transform_indices = @transform_1, window_bounds = array<i64: 16, 128>}, {pipeline_mode = #tpu.pipeline_mode<synchronous>, transform_indices = @transform_2, window_bounds = array<i64: 96, 16>}, {pipeline_mode = #tpu.pipeline_mode<synchronous>, transform_indices = @transform_3, window_bounds = array<i64: 384, 128>}, {pipeline_mode = #tpu.pipeline_mode<synchronous>, transform_indices = @transform_4, window_bounds = array<i64: 8, 128>}, {transform_indices = @transform_5, window_bounds = array<i64: 96, 128>}]} {
    %c0 = arith.constant 0 : index
    %c0_0 = arith.constant 0 : index
    %0 = vector.load %arg5[%c0, %c0_0] : memref<8x128xf32, #tpu.memory_space<vmem>>, vector<1x128xf32>
    %c1 = arith.constant 1 : index
    %c0_1 = arith.constant 0 : index
    %1 = vector.load %arg5[%c1, %c0_1] : memref<8x128xf32, #tpu.memory_space<vmem>>, vector<1x128xf32>
    %c2 = arith.constant 2 : index
    %c0_2 = arith.constant 0 : index
    %2 = vector.load %arg5[%c2, %c0_2] : memref<8x128xf32, #tpu.memory_space<vmem>>, vector<1x128xf32>
    %c3 = arith.constant 3 : index
    %c0_3 = arith.constant 0 : index
    %3 = vector.load %arg5[%c3, %c0_3] : memref<8x128xf32, #tpu.memory_space<vmem>>, vector<1x128xf32>
    %c4 = arith.constant 4 : index
    %c0_4 = arith.constant 0 : index
    %4 = vector.load %arg5[%c4, %c0_4] : memref<8x128xf32, #tpu.memory_space<vmem>>, vector<1x128xf32>
    %c5 = arith.constant 5 : index
    %c0_5 = arith.constant 0 : index
    %5 = vector.load %arg5[%c5, %c0_5] : memref<8x128xf32, #tpu.memory_space<vmem>>, vector<1x128xf32>
    %c6 = arith.constant 6 : index
    %c0_6 = arith.constant 0 : index
    %6 = vector.load %arg5[%c6, %c0_6] : memref<8x128xf32, #tpu.memory_space<vmem>>, vector<1x128xf32>
    %c0_7 = arith.constant 0 : index
    %c0_8 = arith.constant 0 : index
    %7 = vector.load %arg1[%c0_7, %c0_8] : memref<96x2xf32, #tpu.memory_space<vmem>>, vector<96x1xf32>
    %c0_9 = arith.constant 0 : index
    %c1_10 = arith.constant 1 : index
    %8 = vector.load %arg1[%c0_9, %c1_10] : memref<96x2xf32, #tpu.memory_space<vmem>>, vector<96x1xf32>
    %9 = vector.broadcast %7 : vector<96x1xf32> to vector<96x128xf32>
    %10 = vector.broadcast %0 : vector<1x128xf32> to vector<96x128xf32>
    %11 = arith.mulf %9, %10 : vector<96x128xf32>
    %12 = vector.broadcast %8 : vector<96x1xf32> to vector<96x128xf32>
    %13 = vector.broadcast %1 : vector<1x128xf32> to vector<96x128xf32>
    %14 = arith.mulf %12, %13 : vector<96x128xf32>
    %15 = arith.addf %11, %14 : vector<96x128xf32>
    %16 = vector.broadcast %2 : vector<1x128xf32> to vector<96x128xf32>
    %17 = arith.addf %15, %16 : vector<96x128xf32>
    %cst = arith.constant 0.000000e+00 : f32
    %18 = vector.broadcast %cst : f32 to vector<96x128xf32>
    %19 = arith.maximumf %17, %18 : vector<96x128xf32>
    %c0_11 = arith.constant 0 : index
    %c0_12 = arith.constant 0 : index
    %20 = vector.load %arg4[%c0_11, %c0_12] : memref<384x128xf32, #tpu.memory_space<vmem>>, vector<128x128xf32>
    %cst_13 = arith.constant dense<0.000000e+00> : vector<96x128xf32>
    %21 = tpu.matmul %19, %20, %cst_13 {dimension_numbers = #tpu.dot_dimension_numbers<[1], [0], [0], [1], [0, 0, 1, 1], [], []>} : vector<96x128xf32>, vector<128x128xf32>, vector<96x128xf32> -> vector<96x128xf32>
    %cst_14 = arith.constant dense<0.000000e+00> : vector<96xf32>
    %22 = vector.multi_reduction <add>, %21, %cst_14 [1] : vector<96x128xf32> to vector<96xf32>
    %23 = vector.shape_cast %22 : vector<96xf32> to vector<96x1xf32>
    %24 = arith.mulf %21, %21 : vector<96x128xf32>
    %cst_15 = arith.constant dense<0.000000e+00> : vector<96xf32>
    %25 = vector.multi_reduction <add>, %24, %cst_15 [1] : vector<96x128xf32> to vector<96xf32>
    %26 = vector.shape_cast %25 : vector<96xf32> to vector<96x1xf32>
    %cst_16 = arith.constant 7.812500e-03 : f32
    %27 = vector.broadcast %cst_16 : f32 to vector<96x1xf32>
    %28 = arith.mulf %23, %27 : vector<96x1xf32>
    %cst_17 = arith.constant 7.812500e-03 : f32
    %29 = vector.broadcast %cst_17 : f32 to vector<96x1xf32>
    %30 = arith.mulf %26, %29 : vector<96x1xf32>
    %31 = arith.mulf %28, %28 : vector<96x1xf32>
    %32 = arith.subf %30, %31 : vector<96x1xf32>
    %cst_18 = arith.constant 0.000000e+00 : f32
    %33 = vector.broadcast %cst_18 : f32 to vector<96x1xf32>
    %34 = arith.maximumf %32, %33 : vector<96x1xf32>
    %35 = vector.broadcast %28 : vector<96x1xf32> to vector<96x128xf32>
    %36 = arith.subf %21, %35 : vector<96x128xf32>
    %cst_19 = arith.constant 9.99999974E-6 : f32
    %37 = vector.broadcast %cst_19 : f32 to vector<96x1xf32>
    %38 = arith.addf %34, %37 : vector<96x1xf32>
    %39 = math.rsqrt %38 : vector<96x1xf32>
    %40 = vector.broadcast %39 : vector<96x1xf32> to vector<96x128xf32>
    %41 = arith.mulf %36, %40 : vector<96x128xf32>
    %42 = vector.broadcast %3 : vector<1x128xf32> to vector<96x128xf32>
    %43 = arith.mulf %41, %42 : vector<96x128xf32>
    %44 = vector.broadcast %4 : vector<1x128xf32> to vector<96x128xf32>
    %45 = arith.addf %43, %44 : vector<96x128xf32>
    %cst_20 = arith.constant 0.000000e+00 : f32
    %46 = vector.broadcast %cst_20 : f32 to vector<96x128xf32>
    %47 = arith.maximumf %45, %46 : vector<96x128xf32>
    %c0_21 = arith.constant 0 : index
    %c0_22 = arith.constant 0 : index
    %48 = vector.load %arg2[%c0_21, %c0_22] : memref<16x128xf32, #tpu.memory_space<vmem>>, vector<16x128xf32>
    %c256 = arith.constant 256 : index
    %c0_23 = arith.constant 0 : index
    %49 = vector.load %arg4[%c256, %c0_23] : memref<384x128xf32, #tpu.memory_space<vmem>>, vector<128x128xf32>
    %cst_24 = arith.constant dense<0.000000e+00> : vector<16x128xf32>
    %50 = tpu.matmul %48, %49, %cst_24 {dimension_numbers = #tpu.dot_dimension_numbers<[1], [0], [0], [1], [0, 0, 1, 1], [], []>} : vector<16x128xf32>, vector<128x128xf32>, vector<16x128xf32> -> vector<16x128xf32>
    %c128 = arith.constant 128 : index
    %c0_25 = arith.constant 0 : index
    %51 = vector.load %arg4[%c128, %c0_25] : memref<384x128xf32, #tpu.memory_space<vmem>>, vector<128x128xf32>
    %cst_26 = arith.constant dense<0.000000e+00> : vector<96x128xf32>
    %52 = tpu.matmul %47, %51, %cst_26 {dimension_numbers = #tpu.dot_dimension_numbers<[1], [0], [0], [1], [0, 0, 1, 1], [], []>} : vector<96x128xf32>, vector<128x128xf32>, vector<96x128xf32> -> vector<96x128xf32>
    %c0_27 = arith.constant 0 : index
    %c0_28 = arith.constant 0 : index
    %53 = vector.load %arg3[%c0_27, %c0_28] : memref<96x16xf32, #tpu.memory_space<vmem>>, vector<96x16xf32>
    %cst_29 = arith.constant dense<0.000000e+00> : vector<96x128xf32>
    %54 = tpu.matmul %53, %50, %cst_29 {dimension_numbers = #tpu.dot_dimension_numbers<[1], [0], [0], [1], [0, 0, 1, 1], [], []>} : vector<96x16xf32>, vector<16x128xf32>, vector<96x128xf32> -> vector<96x128xf32>
    %55 = arith.addf %52, %54 : vector<96x128xf32>
    %cst_30 = arith.constant dense<0.000000e+00> : vector<96xf32>
    %56 = vector.multi_reduction <add>, %55, %cst_30 [1] : vector<96x128xf32> to vector<96xf32>
    %57 = vector.shape_cast %56 : vector<96xf32> to vector<96x1xf32>
    %58 = arith.mulf %55, %55 : vector<96x128xf32>
    %cst_31 = arith.constant dense<0.000000e+00> : vector<96xf32>
    %59 = vector.multi_reduction <add>, %58, %cst_31 [1] : vector<96x128xf32> to vector<96xf32>
    %60 = vector.shape_cast %59 : vector<96xf32> to vector<96x1xf32>
    %cst_32 = arith.constant 7.812500e-03 : f32
    %61 = vector.broadcast %cst_32 : f32 to vector<96x1xf32>
    %62 = arith.mulf %57, %61 : vector<96x1xf32>
    %cst_33 = arith.constant 7.812500e-03 : f32
    %63 = vector.broadcast %cst_33 : f32 to vector<96x1xf32>
    %64 = arith.mulf %60, %63 : vector<96x1xf32>
    %65 = arith.mulf %62, %62 : vector<96x1xf32>
    %66 = arith.subf %64, %65 : vector<96x1xf32>
    %cst_34 = arith.constant 0.000000e+00 : f32
    %67 = vector.broadcast %cst_34 : f32 to vector<96x1xf32>
    %68 = arith.maximumf %66, %67 : vector<96x1xf32>
    %69 = vector.broadcast %62 : vector<96x1xf32> to vector<96x128xf32>
    %70 = arith.subf %55, %69 : vector<96x128xf32>
    %cst_35 = arith.constant 9.99999974E-6 : f32
    %71 = vector.broadcast %cst_35 : f32 to vector<96x1xf32>
    %72 = arith.addf %68, %71 : vector<96x1xf32>
    %73 = math.rsqrt %72 : vector<96x1xf32>
    %74 = vector.broadcast %73 : vector<96x1xf32> to vector<96x128xf32>
    %75 = arith.mulf %70, %74 : vector<96x128xf32>
    %76 = vector.broadcast %5 : vector<1x128xf32> to vector<96x128xf32>
    %77 = arith.mulf %75, %76 : vector<96x128xf32>
    %78 = vector.broadcast %6 : vector<1x128xf32> to vector<96x128xf32>
    %79 = arith.addf %77, %78 : vector<96x128xf32>
    %cst_36 = arith.constant 0.000000e+00 : f32
    %80 = vector.broadcast %cst_36 : f32 to vector<96x128xf32>
    %81 = arith.maximumf %79, %80 : vector<96x128xf32>
    %c0_37 = arith.constant 0 : index
    %c0_38 = arith.constant 0 : index
    %82 = vector.load %arg6[%c0_37, %c0_38] : memref<96x128xf32, #tpu.memory_space<vmem>>, vector<96x128xf32>
    tpu.vector_store %arg6[%c0_37, %c0_38], %81 {strides = array<i32>} : memref<96x128xf32, #tpu.memory_space<vmem>>, vector<96x128xf32>,
    return
  }
  func.func @transform_0(%arg0: i32) -> (i32, i32) {
    %c0_i32 = arith.constant 0 : i32
    %c0_i32_0 = arith.constant 0 : i32
    return %arg0, %c0_i32 : i32, i32
  }
  func.func @transform_1(%arg0: i32) -> (i32, i32) {
    %c0_i32 = arith.constant 0 : i32
    %c0_i32_0 = arith.constant 0 : i32
    return %arg0, %c0_i32 : i32, i32
  }
  func.func @transform_2(%arg0: i32) -> (i32, i32) {
    %c0_i32 = arith.constant 0 : i32
    %c0_i32_0 = arith.constant 0 : i32
    %c0_i32_1 = arith.constant 0 : i32
    return %c0_i32, %c0_i32_0 : i32, i32
  }
  func.func @transform_3(%arg0: i32) -> (i32, i32) {
    %c0_i32 = arith.constant 0 : i32
    %c0_i32_0 = arith.constant 0 : i32
    %c0_i32_1 = arith.constant 0 : i32
    return %c0_i32, %c0_i32_0 : i32, i32
  }
  func.func @transform_4(%arg0: i32) -> (i32, i32) {
    %c0_i32 = arith.constant 0 : i32
    %c0_i32_0 = arith.constant 0 : i32
    %c0_i32_1 = arith.constant 0 : i32
    return %c0_i32, %c0_i32_0 : i32, i32
  }
  func.func @transform_5(%arg0: i32) -> (i32, i32) {
    %c0_i32 = arith.constant 0 : i32
    %c0_i32_0 = arith.constant 0 : i32
    return %arg0, %c0_i32 : i32, i32
  }
}

</mosaic_0001>

<bundles_post_ra>
// kernel: tpu_custom_call.1
= control target key start
LH: loop header
LB: loop body
LE: loop exit
PB: predicated region body
PF: predicated region fallthrough
CT: control target
= control target key end

     0   :  { %10 = vsyncpa [#allocation3], 0  ;;  %s2920_s0 = inlined_call_operand.vmem [shape: f32[288,2], index: 0, kind: input, shape index: {}]   ;;  %s2921_s1 = inlined_call_operand.hbm [shape: f32[48,128], index: 1, kind: input, shape index: {}]   ;;  %s2922_s2 = inlined_call_operand.vmem [shape: f32[96,16], index: 2, kind: input, shape index: {}]   ;;  %s2923_s3 = inlined_call_operand.vmem [shape: f32[384,128], index: 3, kind: input, shape index: {}]   ;;  %s2924_s4 = inlined_call_operand.vmem [shape: f32[8,128], index: 4, kind: input, shape index: {}]   ;;  %s2925_s5 = inlined_call_operand.hbm [shape: f32[288,128], index: 5, kind: output, shape index: {}]  }
   0x1   :  { %12 = vsyncpa [#allocation3 + $0x1], 0 }
   0x2   :  { %13 = vsyncpa [#allocation4], 0 }
   0x3   :  { %15 = vsyncpa [#allocation4 + $0x1], 0  ;;  %s2182_s18 = smov 0   ;;  %s2184_s19 = smov 0  }
   0x4   :  { %s2186_s20 = smov 0   ;;  %s2188_s21 = smov 0  }
   0x5 LB: > { %s2203_s22 = sadd.s32 4294967295, %s2142_s21   ;;  %s1550_s23 = sadd.s32 4294967294, %s2142_s21   ;;  %s2142_s21 = sphi %s2188_s21, %s2937_s21   ;;  %s2138_s20 = sphi %s2186_s20, %s2936_s20   ;;  %s2134_s19 = sphi %s2184_s19, %s2935_s19   ;;  %s2130_s18 = sphi %s2182_s18, %s2934_s18  }
   0x6   : > { %s2207_s24 = sadd.s32 1, %s2142_s21   ;;  %s54_s25 = sadd.s32 1, %s2138_s20 }
   0x7   : > { %s51_s26 = ssub.s32 %s2142_s21, %s2207_s24  ;;  %p61_p0 = scmp.ne.s32.totalorder %s2138_s20, %s2134_s19 }
   0x8   : > { %p52_p1 = scmp.eq.s32.totalorder %s51_s26, 0  ;;  %p62_p2 = scmp.eq.s32.totalorder %s2142_s21, 0 }
   0x9   : > { %p67_p3 = scmp.ne.s32.totalorder %s2134_s19, %s2130_s18  ;;  %p68_p4 = scmp.eq.s32.totalorder %s2203_s22, 0 }
   0xa   : > { %s2219_s27 = scalar_select %p52_p1, %s2138_s20, %s54_s25  }
   0xb   : > { %p2221_p5 = por %p62_p2, %p61_p0  ;;  %p2225_p6 = por %p68_p4, %p67_p3 }
   0xc   : > { %p154_p7 = scmp.eq.s32.totalorder %s2203_s22, 2  ;;  %p160_p8 = scmp.eq.s32.totalorder %s1550_s23, 2 }
   0xd   : > { %p1953_p9 = scmp.lt.s32.totalorder %s2142_s21, 3  ;;  %s198_s7 = sand.u32 1, %s2138_s20  }
   0xe   : > { %p2231_p10 = por %p154_p7, %p61_p0  ;;  %p2235_p11 = por %p160_p8, %p67_p3 }
   0xf   : > { %s1581_s8 = sshll.u32 %s2142_s21, 8  ;;  %s1553_s9 = sshll.u32 %s198_s7, 4 }
  0x10   : > { %s2929_s30 = scalar_select %p2231_p10, 1, 0 }
  0x11   : > { %s2930_s6 = scalar_select %p2235_p11, 1, 0 }
  0x12   : > { %s2244_s12 = scalar_lea.hbm %s2921_s1, %s1581_s8  ;;  %s202_s13 = scalar_lea.vmem [#allocation2], %s1553_s9 }
  0x13   : > { %s209_s14 = sshll.u32 %s202_s13, 4  ;;  %p2248_p12 = pnand %p1953_p9, %p2221_p5  ;;  %s2252_s14 = int_to_ptr.vmem [resolvable:$true] %s209_s14 }
  0x14   : > { %s2254_s16 = scalar_lea.sflag [#allocation3], %s198_s7  ;;  %s2046_s17 = scalar_lea.hbm %s2244_s12, 256 }
  0x15   : > { %p2047_p13 = scmp.ne.s32.totalorder %s2244_s12, %s2046_s17  ;;  %p2048_p0 = pneg %p2248_p12 }
  0x16   : > { %s2051_s26 = scalar_lea.hbm %s2921_s1, 768  ;;  %p2052_p3 = scmp.lt.u32.totalorder %s2244_s12, %s2921_s1 }
  0x17   : > { %p2049_p1 = pnand %p2048_p0, %p2047_p13  ;;  %p2053_p4 = scmp.lt.u32.totalorder %s2051_s26, %s2046_s17 }
  0x18   : > { %p2055_p7 = scmp.lt.u32.totalorder %s2046_s17, %s2244_s12 }
  0x19   : > { %p2050_p2 = pneg %p2049_p1  ;;  %p2054_p5 = por %p2053_p4, %p2052_p3 }
  0x1b   : > { %p2056_p8 = por %p2055_p7, %p2054_p5 }
  0x1d   : > { %p2057_p9 = pnand %p2056_p8, %p2050_p2 }
  0x1f   : > { %2060 = shalt.err (!%p2057_p9)
}
  0x20   : > { %s2061_s7 = scalar_lea.vmem %s2252_s14, 256  ;;  %s2144_s9 = smov [#allocation2]  }
  0x21   : > { %p2062_p13 = scmp.ne.s32.totalorder %s2252_s14, %s2061_s7  ;;  %s2066_s10 = sshll.u32 %s2144_s9, 4  ;;  %s2067_s10 = int_to_ptr.vmem [resolvable:$false] %s2066_s10 }
  0x22   : > { %s2068_s11 = scalar_lea.vmem %s2067_s10, 512  ;;  %p2069_p10 = scmp.lt.s32.totalorder %s2252_s14, %s2067_s10 }
  0x23   : > { %p2064_p1 = pnand %p2062_p13, %p2048_p0  ;;  %p2070_p3 = scmp.lt.s32.totalorder %s2068_s11, %s2061_s7 }
  0x25   : > { %p2065_p11 = pneg %p2064_p1  ;;  %p2071_p4 = por %p2070_p3, %p2069_p10 }
  0x27   : > { %p2072_p5 = pnand %p2071_p4, %p2065_p11 }
  0x29   : > { %2075 = shalt.err (!%p2072_p5)
}
  0x2a   : > { %s2145_s13 = smov 128   ;;  %s2146_s17 = smov 8  }
  0x2b   : > { %1948 = dma.hbm_to_vmem [thread:$0]  (!%p2248_p12), %s2244_s12, 256, %s2252_s14, %s2254_s16, %s2145_s13, %s2145_s13, %s2146_s17  }
  0x2c   : > { %p1556_p0 = scmp.ge.s32.totalorder %s2142_s21, 1  ;;  %p217_p2 = scmp.lt.s32.totalorder %s2142_s21, 4 }
  0x2e   : > { %p218_p7 = pnand %p1556_p0, %p217_p2 }
  0x2f   : > { %s2285_s23 = sand.u32 (!%p218_p7), 1, %s2134_s19  }
  0x30   : > { %221 = sbr.rel (%p218_p7) target bundleno = 1035 (0x40b), region = 40  ;;  %s1557_s25 = sshll.u32 (!%p218_p7), %s2285_s23, 4 }
  0x31   : > { %s224_s26 = scalar_lea.sflag (!%p218_p7), [#allocation3], %s2285_s23  ;;  %s2289_s28 = scalar_lea.vmem (!%p218_p7), [#allocation2], %s1557_s25 }
  0x37   : > { %2121 = dma.done.wait (%p2225_p6), %s224_s26, 256  }
  0x38   : > { %2123 = vsyncadd (%p2225_p6), %s224_s26, 4294967040  ;;  %s259_s12 = smul.u32 12, %s2203_s22  ;;  %v2147_v0 = vmov 0   ;;  %v466_v1 = vld [vmem:[%s2923_s3] sm:$0xff]  ;;  %v467_v2 = vld [vmem:[%s2923_s3 + $0x8] sm:$0xff]  ;;  %v2148_v10 = vmov 1  }
  0x39   : > { %1995 = vset.pattern.permute.xlu1 %v2147_v0  ;;  %1993 = vset.pattern.permute.xlu0 %v2147_v0  ;;  %v1828_v5 = vpack.c.bf16 %v467_v2, %v466_v1  ;;  %v468_v6 = vld [vmem:[%s2923_s3 + $0x10] sm:$0xff]  ;;  %v469_v7 = vld [vmem:[%s2923_s3 + $0x18] sm:$0xff]  ;;  %v470_v8 = vld [vmem:[%s2923_s3 + $0x20] sm:$0xff]  ;;  %vm940_vm0 = vcmask 130048   ;;  %s1940_s10 = smul.u32 96, %s2285_s23  ;;  %p2932_p11 = scmp.ne.s32.totalorder %s2929_s30, 0 }
  0x3a   : > { %p260_p10 = scmp.lt.s32.totalorder %s259_s12, 35  ;;  %v471_v9 = vld [vmem:[%s2923_s3 + $0x28] sm:$0xff]  ;;  %v1832_v11 = vpack.c.bf16 %v469_v7, %v468_v6  ;;  %v472_v13 = vld [vmem:[%s2923_s3 + $0x30] sm:$0xff]  ;;  %v473_v14 = vld [vmem:[%s2923_s3 + $0x38] sm:$0xff]  ;;  %s1582_s25 = smul.u32 1536, %s2203_s22 }
  0x3b   : > { %1829 = vmatprep.subr.bf16.mxu0 %v1828_v5  ;;  %v1836_v12 = vpack.c.bf16 %v471_v9, %v470_v8  ;;  %v1840_v16 = vpack.c.bf16 %v473_v14, %v472_v13  ;;  %v474_v17 = vld [vmem:[%s2923_s3 + $0x40] sm:$0xff]  ;;  %v475_v18 = vld [vmem:[%s2923_s3 + $0x48] sm:$0xff]  ;;  %v476_v21 = vld [vmem:[%s2923_s3 + $0x50] sm:$0xff]  ;;  %s2808_s17 = scalar_lea.vmem [#allocation5], %s1940_s10  ;;  %s1452_s22 = scalar_lea.sflag [#allocation4], %s2285_s23 }
  0x3c   : > { %s2939_s12 = smov (!%p260_p10, %s259_s12), 35  ;;  %1831 = vmatpush3.bf16.msra.mxu0 %v1828_v5  ;;  %v1844_v20 = vpack.c.bf16 %v475_v18, %v474_v17  ;;  %v477_v22 = vld [vmem:[%s2923_s3 + $0x58] sm:$0xff]  ;;  %v478_v25 = vld [vmem:[%s2923_s3 + $0x60] sm:$0xff]  ;;  %v479_v26 = vld [vmem:[%s2923_s3 + $0x68] sm:$0xff]  ;;  %s1465_s26 = sshll.u32 %s2808_s17, 4  ;;  %s2875_s26 = int_to_ptr.vmem [resolvable:$true] %s1465_s26 }
  0x3d   : > { %s1558_s14 = sshll.u32 %s2939_s12, 3  ;;  %1833 = vmatprep.subr.bf16.mxu0 %v1832_v11  ;;  %v1848_v24 = vpack.c.bf16 %v477_v22, %v476_v21  ;;  %v1852_v28 = vpack.c.bf16 %v479_v26, %v478_v25  ;;  %v480_v29 = vld [vmem:[%s2923_s3 + $0x70] sm:$0xff]  ;;  %v481_v30 = vld [vmem:[%s2923_s3 + $0x78] sm:$0xff]  ;;  %v821_v38 = vld [vmem:[%s2923_s3 + $0x100] sm:$0xff]  ;;  %s2873_s15 = scalar_lea.hbm %s2925_s5, %s1582_s25 }
  0x3e   : > { %s2299_s8 = scalar_lea.vmem %s2920_s0, %s1558_s14  ;;  %v1856_v32 = vpack.c.bf16 %v481_v30, %v480_v29  ;;  %v822_v39 = vld [vmem:[%s2923_s3 + $0x108] sm:$0xff]  ;;  %v2370_v43 = vld [vmem:[%s2924_s4] ss:$0 sm:$0xff]  ;;  %v2375_v44 = vld [vmem:[%s2924_s4 + $0x1] ss:$0 sm:$0xff]  ;;  %s2149_s16 = smov [#allocation5]  }
  0x3f   : > { %v275_v3 = vld [vmem:[%s2299_s8 + $0x8] sm:$0xff]  ;;  %v274_v4 = vld [vmem:[%s2299_s8] sm:$0xff]  ;;  %v276_v15 = vld [vmem:[%s2299_s8 + $0x10] sm:$0xff]  ;;  %v1860_v40 = vpack.c.bf16 %v822_v39, %v821_v38  ;;  %s2080_s7 = sshll.u32 %s2149_s16, 4  ;;  %s2081_s7 = int_to_ptr.vmem [resolvable:$false] %s2080_s7 }
  0x40   : > { %293 = vperm.xlu1 %1995, %v275_v3   ;;  %288 = vperm.xlu0 %1993, %v274_v4   ;;  %v277_v19 = vld [vmem:[%s2299_s8 + $0x18] sm:$0xff]  ;;  %v278_v23 = vld [vmem:[%s2299_s8 + $0x20] sm:$0xff]  ;;  %v279_v27 = vld [vmem:[%s2299_s8 + $0x28] sm:$0xff]  ;;  %s2082_s9 = scalar_lea.vmem %s2081_s7, 3072  ;;  %p2083_p9 = scmp.lt.s32.totalorder %s2875_s26, %s2081_s7 }
  0x41   : > { %1835 = vmatpush3.bf16.msra.mxu0 %v1832_v11  ;;  %v280_v31 = vld [vmem:[%s2299_s8 + $0x30] sm:$0xff]  ;;  %v281_v33 = vld [vmem:[%s2299_s8 + $0x38] sm:$0xff]  ;;  %v282_v34 = vld [vmem:[%s2299_s8 + $0x40] sm:$0xff] }
  0x42   : > { %1837 = vmatprep.subr.bf16.mxu0 %v1836_v12  ;;  %v283_v35 = vld [vmem:[%s2299_s8 + $0x48] sm:$0xff]  ;;  %v284_v36 = vld [vmem:[%s2299_s8 + $0x50] sm:$0xff]  ;;  %v285_v37 = vld [vmem:[%s2299_s8 + $0x58] sm:$0xff]  ;;  %s2076_s8 = scalar_lea.vmem %s2875_s26, 1536 }
  0x43   : > { %v2384_v51 = vld [vmem:[%s2924_s4 + $0x2] ss:$0 sm:$0xff]  ;;  %v823_v59 = vld [vmem:[%s2923_s3 + $0x110] sm:$0xff]  ;;  %v824_v60 = vld [vmem:[%s2923_s3 + $0x118] sm:$0xff]  ;;  %p2077_p6 = scmp.ne.s32.totalorder %s2875_s26, %s2076_s8  ;;  %p2084_p13 = scmp.lt.s32.totalorder %s2082_s9, %s2076_s8 }
  0x44   : > { %1996 = vset.pattern.permute.xlu1 %v2148_v10  ;;  %1994 = vset.pattern.permute.xlu0 %v2148_v10  ;;  %v1864_v2 = vpack.c.bf16 %v824_v60, %v823_v59  ;;  %v825_v5 = vld [vmem:[%s2923_s3 + $0x120] sm:$0xff]  ;;  %v826_v6 = vld [vmem:[%s2923_s3 + $0x128] sm:$0xff]  ;;  %v836_v59 = vld [vmem:[%s2923_s3 + $0x178] sm:$0xff] }
  0x45   : > { %367 = vperm.xlu1 %1996, %v275_v3   ;;  %363 = vperm.xlu0 %1994, %v274_v4   ;;  %v829_v25 = vld [vmem:[%s2923_s3 + $0x140] sm:$0xff]  ;;  %v830_v26 = vld [vmem:[%s2923_s3 + $0x148] sm:$0xff]  ;;  %p2078_p12 = pnand %p2077_p6, %p2932_p11  ;;  %p2085_p1 = por %p2084_p13, %p2083_p9 }
  0x46   : > { %1839 = vmatpush3.bf16.msra.mxu0 %v1836_v12  ;;  %v1868_v12 = vpack.c.bf16 %v826_v6, %v825_v5 }
  0x47   : > { %1841 = vmatprep.subr.bf16.mxu0 %v1840_v16  ;;  %p2079_p8 = pneg %p2078_p12 }
  0x49   : > { %1997 = vset.pattern.permute.xlu1 %v2147_v0  ;;  %371 = vperm.xlu0 %1994, %v276_v15   ;;  %p2086_p3 = pnand %p2085_p1, %p2079_p8 }
  0x4a   : > { %298 = vperm.xlu1 %1997, %v276_v15   ;;  %1843 = vmatpush3.bf16.msra.mxu0 %v1840_v16  ;;  %v827_v15 = vld [vmem:[%s2923_s3 + $0x130] sm:$0xff]  ;;  %v828_v16 = vld [vmem:[%s2923_s3 + $0x138] sm:$0xff] }
  0x4b   : > { %1845 = vmatprep.subr.bf16.mxu0 %v1844_v20  ;;  %v1872_v22 = vpack.c.bf16 %v828_v16, %v827_v15 }
  0x4d   : > { %375 = vperm.xlu0 %1994, %v277_v19  }
  0x4e   : > { %303 = vperm.xlu1 %1997, %v277_v19   ;;  %1847 = vmatpush3.bf16.msra.mxu0 %v1844_v20 }
  0x4f   : > { %1849 = vmatprep.subr.bf16.mxu0 %v1848_v24 }
  0x51   : > { %379 = vperm.xlu0 %1994, %v278_v23  }
  0x52   : > { %308 = vperm.xlu1 %1997, %v278_v23   ;;  %1851 = vmatpush3.bf16.msra.mxu0 %v1848_v24 }
  0x53   : > { %1853 = vmatprep.subr.bf16.mxu0 %v1852_v28 }
  0x55   : > { %383 = vperm.xlu0 %1994, %v279_v27  }
  0x56   : > { %313 = vperm.xlu1 %1997, %v279_v27   ;;  %1855 = vmatpush3.bf16.msra.mxu0 %v1852_v28 }
  0x57   : > { %1857 = vmatprep.subr.bf16.mxu0 %v1856_v32 }
  0x59   : > { %387 = vperm.xlu0 %1994, %v280_v31  }
  0x5a   : > { %318 = vperm.xlu1 %1997, %v280_v31   ;;  %1859 = vmatpush3.bf16.msra.mxu0 %v1856_v32  ;;  %v1876_v32 = vpack.c.bf16 %v830_v26, %v829_v25  ;;  %v820_v25 = vld [vmem:[%s2289_s28 + $0x8] sm:$0xff] }
  0x5b   : > { %1861 = vmatprep.subr.bf16.mxu0 %v1860_v40 }
  0x5d   : > { %391 = vperm.xlu0 %1994, %v281_v33  }
  0x5e   : > { %323 = vperm.xlu1 %1997, %v281_v33  }
  0x61   : > { %395 = vperm.xlu0 %1994, %v282_v34  }
  0x62   : > { %328 = vperm.xlu1 %1997, %v282_v34  }
  0x65   : > { %399 = vperm.xlu0 %1994, %v283_v35  }
  0x66   : > { %333 = vperm.xlu1 %1997, %v283_v35   ;;  %v831_v35 = vld [vmem:[%s2923_s3 + $0x150] sm:$0xff] }
  0x69   : > { %403 = vperm.xlu0 %1994, %v284_v36  }
  0x6a   : > { %338 = vperm.xlu1 %1997, %v284_v36   ;;  %v832_v36 = vld [vmem:[%s2923_s3 + $0x158] sm:$0xff] }
  0x6d   : > { %407 = vperm.xlu0 %1994, %v285_v37  }
  0x6e   : > { %343 = vperm.xlu1 %1997, %v285_v37  }
  0xbf   : > { %v294_v41 = vpop.permute.xlu1 %293  ;;  %v289_v42 = vpop.permute.xlu0 %288 }
  0xc0   : > { %v351_v47 = vmul.f32 %v2370_v43, %v294_v41  ;;  %v350_v48 = vmul.f32 %v2370_v43, %v289_v42  ;;  %v1880_v42 = vpack.c.bf16 %v832_v36, %v831_v35 }
  0xc4   : > { %v368_v45 = vpop.permute.xlu1 %367  ;;  %v364_v46 = vpop.permute.xlu0 %363 }
  0xc5   : > { %v415_v49 = vmul.f32 %v2375_v44, %v368_v45  ;;  %v414_v50 = vmul.f32 %v2375_v44, %v364_v46 }
  0xc7   : > { %v427_v52 = vadd.f32 %v415_v49, %v351_v47  ;;  %v426_v53 = vadd.f32 %v414_v50, %v350_v48  ;;  %v833_v47 = vld [vmem:[%s2923_s3 + $0x160] sm:$0xff]  ;;  %v834_v48 = vld [vmem:[%s2923_s3 + $0x168] sm:$0xff] }
  0xc8   : > { %v372_v54 = vpop.permute.xlu0 %371 }
  0xc9   : > { %v416_v55 = vmul.f32 %v2375_v44, %v372_v54  ;;  %v299_v56 = vpop.permute.xlu1 %298  ;;  %v442_v57 = vadd.f32 %v2384_v51, %v426_v53  ;;  %v443_v58 = vadd.f32 %v2384_v51, %v427_v52 }
  0xca   : > { %v352_v61 = vmul.f32 %v2370_v43, %v299_v56 }
  0xcb   : > { %v454_v62 = vmax.f32 %v442_v57, 0.0  ;;  %v455_v63 = vmax.f32 %v443_v58, 0.0  ;;  %v835_v58 = vld [vmem:[%s2923_s3 + $0x170] sm:$0xff] }
  0xcc   : > { %v428_v0 = vadd.f32 %v416_v55, %v352_v61  ;;  %v376_v1 = vpop.permute.xlu0 %375  ;;  %v1884_v55 = vpack.c.bf16 %v834_v48, %v833_v47  ;;  %v912_v48 = vld [vmem:[%s2923_s3 + $0x80] sm:$0xff] }
  0xcd   : > { %v417_v3 = vmul.f32 %v2375_v44, %v376_v1  ;;  %v304_v4 = vpop.permute.xlu1 %303  ;;  %1703 = vmatprep.mubr.f32.mxu0 %v454_v62  ;;  %v1888_v1 = vpack.c.bf16 %v836_v59, %v835_v58  ;;  %v915_v58 = vld [vmem:[%s2923_s3 + $0x98] sm:$0xff]  ;;  %v929_v59 = vld [vmem:[%s2922_s2 + $0x8] sm:$0xff] }
  0xce   : > { %v353_v7 = vmul.f32 %v2370_v43, %v304_v4  ;;  %1704 = vmatmul.mubr.f32.vlgmr.msra.gmra.mrb[0].mxu0 %v455_v63  ;;  %v444_v8 = vadd.f32 %v2384_v51, %v428_v0 }
  0xcf   : > { %1863 = vmatpush3.bf16.msra.mxu0 %v1860_v40 }
  0xd0   : > { %v429_v9 = vadd.f32 %v417_v3, %v353_v7  ;;  %v380_v10 = vpop.permute.xlu0 %379  ;;  %v456_v11 = vmax.f32 %v444_v8, 0.0  ;;  %1865 = vmatprep.subr.bf16.mxu0 %v1864_v2 }
  0xd1   : > { %v418_v13 = vmul.f32 %v2375_v44, %v380_v10  ;;  %v309_v14 = vpop.permute.xlu1 %308 }
  0xd2   : > { %v354_v17 = vmul.f32 %v2370_v43, %v309_v14  ;;  %1706 = vmatprep.mubr.f32.mxu0 %v456_v11  ;;  %v445_v18 = vadd.f32 %v2384_v51, %v429_v9 }
  0xd3   : > { %1867 = vmatpush3.bf16.msra.mxu0 %v1864_v2 }
  0xd4   : > { %v430_v19 = vadd.f32 %v418_v13, %v354_v17  ;;  %v384_v20 = vpop.permute.xlu0 %383  ;;  %v457_v21 = vmax.f32 %v445_v18, 0.0  ;;  %1869 = vmatprep.subr.bf16.mxu0 %v1868_v12 }
  0xd5   : > { %v419_v23 = vmul.f32 %v2375_v44, %v384_v20  ;;  %v314_v24 = vpop.permute.xlu1 %313 }
  0xd6   : > { %v355_v27 = vmul.f32 %v2370_v43, %v314_v24  ;;  %1707 = vmatmul.mubr.f32.gmra.mrb[2].mxu0 %v457_v21  ;;  %v446_v28 = vadd.f32 %v2384_v51, %v430_v19  ;;  %v819_v24 = vld [vmem:[%s2289_s28] sm:$0xff] }
  0xd7   : > { %1871 = vmatpush3.bf16.msra.mxu0 %v1868_v12 }
  0xd8   : > { %v431_v29 = vadd.f32 %v419_v23, %v355_v27  ;;  %v388_v30 = vpop.permute.xlu0 %387  ;;  %v458_v31 = vmax.f32 %v446_v28, 0.0  ;;  %1873 = vmatprep.subr.bf16.mxu0 %v1872_v22 }
  0xd9   : > { %v420_v33 = vmul.f32 %v2375_v44, %v388_v30  ;;  %v319_v34 = vpop.permute.xlu1 %318 }
  0xda   : > { %v356_v37 = vmul.f32 %v2370_v43, %v319_v34  ;;  %1709 = vmatprep.mubr.f32.mxu0 %v458_v31  ;;  %v447_v38 = vadd.f32 %v2384_v51, %v431_v29  ;;  %v928_v31 = vld [vmem:[%s2922_s2] sm:$0xff] }
  0xdb   : > { %1875 = vmatpush3.bf16.msra.mxu0 %v1872_v22  ;;  %1760 = vmatprep.mubr.msk.f32.mxu1 %vm940_vm0, %v928_v31 }
  0xdc   : > { %v432_v39 = vadd.f32 %v420_v33, %v356_v37  ;;  %v392_v40 = vpop.permute.xlu0 %391  ;;  %v459_v41 = vmax.f32 %v447_v38, 0.0  ;;  %1877 = vmatprep.subr.bf16.mxu0 %v1876_v32 }
  0xdd   : > { %v421_v45 = vmul.f32 %v2375_v44, %v392_v40  ;;  %v324_v46 = vpop.permute.xlu1 %323 }
  0xde   : > { %v357_v49 = vmul.f32 %v2370_v43, %v324_v46  ;;  %1710 = vmatmul.mubr.f32.gmra.mrb[4].mxu0 %v459_v41  ;;  %v448_v50 = vadd.f32 %v2384_v51, %v432_v39 }
  0xdf   : > { %1879 = vmatpush3.bf16.msra.mxu0 %v1876_v32 }
  0xe0   : > { %v433_v52 = vadd.f32 %v421_v45, %v357_v49  ;;  %v396_v53 = vpop.permute.xlu0 %395  ;;  %v460_v54 = vmax.f32 %v448_v50, 0.0  ;;  %1881 = vmatprep.subr.bf16.mxu0 %v1880_v42  ;;  %v913_v49 = vld [vmem:[%s2923_s3 + $0x88] sm:$0xff] }
  0xe1   : > { %v422_v56 = vmul.f32 %v2375_v44, %v396_v53  ;;  %v329_v57 = vpop.permute.xlu1 %328 }
  0xe2   : > { %v358_v60 = vmul.f32 %v2370_v43, %v329_v57  ;;  %1712 = vmatprep.mubr.f32.mxu0 %v460_v54  ;;  %v449_v61 = vadd.f32 %v2384_v51, %v433_v52  ;;  %v914_v57 = vld [vmem:[%s2923_s3 + $0x90] sm:$0xff] }
  0xe3   : > { %1883 = vmatpush3.bf16.msra.mxu0 %v1880_v42 }
  0xe4   : > { %v434_v62 = vadd.f32 %v422_v56, %v358_v60  ;;  %v400_v63 = vpop.permute.xlu0 %399  ;;  %v461_v0 = vmax.f32 %v449_v61, 0.0  ;;  %1885 = vmatprep.subr.bf16.mxu0 %v1884_v55  ;;  %v1896_v56 = vpack.c.bf16 %v913_v49, %v912_v48  ;;  %v1900_v60 = vpack.c.bf16 %v915_v58, %v914_v57  ;;  %v930_v61 = vld [vmem:[%s2922_s2 + $0x10] sm:$0xff] }
  0xe5   : > { %v423_v2 = vmul.f32 %v2375_v44, %v400_v63  ;;  %v334_v3 = vpop.permute.xlu1 %333  ;;  %v917_v63 = vld [vmem:[%s2923_s3 + $0xa8] sm:$0xff] }
  0xe6   : > { %v359_v4 = vmul.f32 %v2370_v43, %v334_v3  ;;  %1713 = vmatmul.mubr.f32.gmra.mrb[6].mxu0 %v461_v0  ;;  %v450_v5 = vadd.f32 %v2384_v51, %v434_v62  ;;  %v916_v62 = vld [vmem:[%s2923_s3 + $0xa0] sm:$0xff]  ;;  %v931_v0 = vld [vmem:[%s2922_s2 + $0x18] sm:$0xff]  ;;  %v918_v3 = vld [vmem:[%s2923_s3 + $0xb0] sm:$0xff] }
  0xe7   : > { %1887 = vmatpush3.bf16.msra.mxu0 %v1884_v55 }
  0xe8   : > { %v435_v6 = vadd.f32 %v423_v2, %v359_v4  ;;  %v404_v7 = vpop.permute.xlu0 %403  ;;  %v462_v8 = vmax.f32 %v450_v5, 0.0  ;;  %1889 = vmatprep.subr.bf16.mxu0 %v1888_v1  ;;  %v932_v2 = vld [vmem:[%s2922_s2 + $0x20] sm:$0xff]  ;;  %v919_v4 = vld [vmem:[%s2923_s3 + $0xb8] sm:$0xff]  ;;  %v933_v5 = vld [vmem:[%s2922_s2 + $0x28] sm:$0xff] }
  0xe9   : > { %v424_v9 = vmul.f32 %v2375_v44, %v404_v7  ;;  %v339_v10 = vpop.permute.xlu1 %338  ;;  %v934_v7 = vld [vmem:[%s2922_s2 + $0x30] sm:$0xff] }
  0xea   : > { %v360_v11 = vmul.f32 %v2370_v43, %v339_v10  ;;  %1715 = vmatprep.mubr.f32.mxu0 %v462_v8  ;;  %v451_v12 = vadd.f32 %v2384_v51, %v435_v6  ;;  %v1908_v6 = vpack.c.bf16 %v919_v4, %v918_v3  ;;  %v920_v8 = vld [vmem:[%s2923_s3 + $0xc0] sm:$0xff]  ;;  %v935_v10 = vld [vmem:[%s2922_s2 + $0x38] sm:$0xff] }
  0xeb   : > { %1891 = vmatpush3.bf16.msra.mxu0 %v1888_v1  ;;  %v1904_v1 = vpack.c.bf16 %v917_v63, %v916_v62 }
  0xec   : > { %v436_v13 = vadd.f32 %v424_v9, %v360_v11  ;;  %v408_v14 = vpop.permute.xlu0 %407  ;;  %v463_v15 = vmax.f32 %v451_v12, 0.0  ;;  %v921_v9 = vld [vmem:[%s2923_s3 + $0xc8] sm:$0xff]  ;;  %v936_v12 = vld [vmem:[%s2922_s2 + $0x40] sm:$0xff] }
  0xed   : > { %v425_v16 = vmul.f32 %v2375_v44, %v408_v14  ;;  %v344_v17 = vpop.permute.xlu1 %343  ;;  %v1912_v11 = vpack.c.bf16 %v921_v9, %v920_v8  ;;  %v923_v14 = vld [vmem:[%s2923_s3 + $0xd8] sm:$0xff] }
  0xee   : > { %v361_v18 = vmul.f32 %v2370_v43, %v344_v17  ;;  %1716 = vmatmul.mubr.f32.gmra.mrb[8].mxu0 %v463_v15  ;;  %v452_v19 = vadd.f32 %v2384_v51, %v436_v13  ;;  %v922_v13 = vld [vmem:[%s2923_s3 + $0xd0] sm:$0xff]  ;;  %v937_v15 = vld [vmem:[%s2922_s2 + $0x48] sm:$0xff] }
  0xef   : > { %v938_v17 = vld [vmem:[%s2922_s2 + $0x50] sm:$0xff] }
  0xf0   : > { %v437_v20 = vadd.f32 %v425_v16, %v361_v18  ;;  %v464_v21 = vmax.f32 %v452_v19, 0.0  ;;  %v1916_v16 = vpack.c.bf16 %v923_v14, %v922_v13  ;;  %v924_v18 = vld [vmem:[%s2923_s3 + $0xe0] sm:$0xff]  ;;  %v925_v19 = vld [vmem:[%s2923_s3 + $0xe8] sm:$0xff] }
  0xf2   : > { %1718 = vmatprep.mubr.f32.mxu0 %v464_v21  ;;  %v453_v22 = vadd.f32 %v2384_v51, %v437_v20  ;;  %v939_v20 = vld [vmem:[%s2922_s2 + $0x58] sm:$0xff]  ;;  %v1920_v21 = vpack.c.bf16 %v925_v19, %v924_v18 }
  0xf4   : > { %v465_v23 = vmax.f32 %v453_v22, 0.0  ;;  %v926_v22 = vld [vmem:[%s2923_s3 + $0xf0] sm:$0xff] }
  0xf6   : > { %1719 = vmatmul.mubr.f32.gmra.mrb[10].mxu0 %v465_v23  ;;  %v927_v23 = vld [vmem:[%s2923_s3 + $0xf8] sm:$0xff] }
  0xf7   : > { %1753 = vmatprep.mubr.f32.mxu0 %v819_v24  ;;  %v1924_v24 = vpack.c.bf16 %v927_v23, %v926_v22 }
  0xfa   : > { %1754 = vmatmul.mubr.f32.vlgmr.msra.gmra.mrb[12].mxu0 %v820_v25 }
 0x1a1   : > { %v2462_v26 = vpop.f32.mrb[0].mxu0 }
 0x1a2   : > { %609 = vadd.xlane.f32.xlu0 %v2462_v26  ;;  %v2465_v44 = vpop.f32.mrb[1].mxu0  ;;  %v632_v51 = vmul.f32 %v2462_v26, %v2462_v26 }
 0x1a3   : > { %607 = vadd.xlane.f32.xlu1 %v2465_v44  ;;  %v631_v43 = vmul.f32 %v2465_v44, %v2465_v44 }
 0x1a6   : > { %643 = vadd.xlane.f32.xlu0 %v631_v43 }
 0x1a7   : > { %645 = vadd.xlane.f32.xlu1 %v632_v51 }
 0x1a9   : > { %v2472_v27 = vpop.f32.mrb[2].mxu0 }
 0x1aa   : > { %v2474_v28 = vpop.f32.mrb[3].mxu0  ;;  %v634_v29 = vmul.f32 %v2472_v27, %v2472_v27 }
 0x1ab   : > { %613 = vadd.xlane.f32.xlu1 %v2472_v27  ;;  %611 = vadd.xlane.f32.xlu0 %v2474_v28  ;;  %v633_v30 = vmul.f32 %v2474_v28, %v2474_v28 }
 0x1af   : > { %649 = vadd.xlane.f32.xlu1 %v634_v29  ;;  %647 = vadd.xlane.f32.xlu0 %v633_v30 }
 0x1b1   : > { %v2486_v32 = vpop.f32.mrb[4].mxu0 }
 0x1b2   : > { %v2488_v33 = vpop.f32.mrb[5].mxu0  ;;  %v636_v34 = vmul.f32 %v2486_v32, %v2486_v32 }
 0x1b3   : > { %617 = vadd.xlane.f32.xlu1 %v2486_v32  ;;  %615 = vadd.xlane.f32.xlu0 %v2488_v33  ;;  %v635_v35 = vmul.f32 %v2488_v33, %v2488_v33 }
 0x1b7   : > { %653 = vadd.xlane.f32.xlu1 %v636_v34  ;;  %651 = vadd.xlane.f32.xlu0 %v635_v35 }
 0x1b9   : > { %v2496_v36 = vpop.f32.mrb[6].mxu0 }
 0x1ba   : > { %v2498_v37 = vpop.f32.mrb[7].mxu0  ;;  %v638_v38 = vmul.f32 %v2496_v36, %v2496_v36 }
 0x1bb   : > { %621 = vadd.xlane.f32.xlu1 %v2496_v36  ;;  %619 = vadd.xlane.f32.xlu0 %v2498_v37  ;;  %v637_v39 = vmul.f32 %v2498_v37, %v2498_v37 }
 0x1bf   : > { %657 = vadd.xlane.f32.xlu1 %v638_v38  ;;  %655 = vadd.xlane.f32.xlu0 %v637_v39 }
 0x1c1   : > { %v2506_v40 = vpop.f32.mrb[8].mxu0 }
 0x1c2   : > { %v2508_v41 = vpop.f32.mrb[9].mxu0  ;;  %v640_v42 = vmul.f32 %v2506_v40, %v2506_v40 }
 0x1c3   : > { %625 = vadd.xlane.f32.xlu1 %v2506_v40  ;;  %623 = vadd.xlane.f32.xlu0 %v2508_v41  ;;  %v639_v45 = vmul.f32 %v2508_v41, %v2508_v41 }
 0x1c7   : > { %661 = vadd.xlane.f32.xlu1 %v640_v42  ;;  %659 = vadd.xlane.f32.xlu0 %v639_v45 }
 0x1c9   : > { %v2516_v46 = vpop.f32.mrb[10].mxu0 }
 0x1ca   : > { %v2518_v47 = vpop.f32.mrb[11].mxu0  ;;  %v642_v50 = vmul.f32 %v2516_v46, %v2516_v46 }
 0x1cb   : > { %629 = vadd.xlane.f32.xlu1 %v2516_v46  ;;  %627 = vadd.xlane.f32.xlu0 %v2518_v47  ;;  %v641_v52 = vmul.f32 %v2518_v47, %v2518_v47 }
 0x1cd   : > { %v1755_v53 = vpop.f32.mrb[12].mxu0 }
 0x1ce   : > { %v903_v54 = vpop.f32.mrb[13].mxu0 }
 0x1cf   : > { %665 = vadd.xlane.f32.xlu1 %v642_v50  ;;  %663 = vadd.xlane.f32.xlu0 %v641_v52  ;;  %v1892_v55 = vpack.c.bf16 %v1755_v53, %v903_v54 }
 0x1d1   : > { %1893 = vmatprep.subr.bf16.mxu1 %v1892_v55 }
 0x1d2   : > { %1895 = vmatpush3.bf16.msra.mxu1 %v1892_v55 }
 0x1d3   : > { %1897 = vmatprep.subr.bf16.mxu1 %v1896_v56 }
 0x1d5   : > { %1761 = vmatmul.mubr.msk.f32.vlgmr.msra.gmra.mrb[0].mxu1 %vm940_vm0, %v929_v59 }
 0x1d6   : > { %1899 = vmatpush3.bf16.msra.mxu1 %v1896_v56  ;;  %1763 = vmatprep.mubr.msk.f32.mxu1 %vm940_vm0, %v930_v61 }
 0x1d7   : > { %1901 = vmatprep.subr.bf16.mxu1 %v1900_v60 }
 0x1d9   : > { %1764 = vmatmul.mubr.msk.f32.gmra.mrb[2].mxu1 %vm940_vm0, %v931_v0 }
 0x1da   : > { %1903 = vmatpush3.bf16.msra.mxu1 %v1900_v60  ;;  %1766 = vmatprep.mubr.msk.f32.mxu1 %vm940_vm0, %v932_v2 }
 0x1db   : > { %1905 = vmatprep.subr.bf16.mxu1 %v1904_v1 }
 0x1dd   : > { %1767 = vmatmul.mubr.msk.f32.gmra.mrb[4].mxu1 %vm940_vm0, %v933_v5 }
 0x1de   : > { %1907 = vmatpush3.bf16.msra.mxu1 %v1904_v1  ;;  %1769 = vmatprep.mubr.msk.f32.mxu1 %vm940_vm0, %v934_v7 }
 0x1df   : > { %1909 = vmatprep.subr.bf16.mxu1 %v1908_v6 }
 0x1e1   : > { %1770 = vmatmul.mubr.msk.f32.gmra.mrb[6].mxu1 %vm940_vm0, %v935_v10 }
 0x1e2   : > { %1911 = vmatpush3.bf16.msra.mxu1 %v1908_v6  ;;  %1772 = vmatprep.mubr.msk.f32.mxu1 %vm940_vm0, %v936_v12 }
 0x1e3   : > { %1913 = vmatprep.subr.bf16.mxu1 %v1912_v11 }
 0x1e5   : > { %1773 = vmatmul.mubr.msk.f32.gmra.mrb[8].mxu1 %vm940_vm0, %v937_v15 }
 0x1e6   : > { %1915 = vmatpush3.bf16.msra.mxu1 %v1912_v11  ;;  %1775 = vmatprep.mubr.msk.f32.mxu1 %vm940_vm0, %v938_v17 }
 0x1e7   : > { %1917 = vmatprep.subr.bf16.mxu1 %v1916_v16 }
 0x1e9   : > { %1776 = vmatmul.mubr.msk.f32.gmra.mrb[10].mxu1 %vm940_vm0, %v939_v20 }
 0x1ea   : > { %1919 = vmatpush3.bf16.msra.mxu1 %v1916_v16 }
 0x1eb   : > { %1921 = vmatprep.subr.bf16.mxu1 %v1920_v21 }
 0x1ee   : > { %1923 = vmatpush3.bf16.msra.mxu1 %v1920_v21 }
 0x1ef   : > { %1925 = vmatprep.subr.bf16.mxu1 %v1924_v24 }
 0x1f2   : > { %1927 = vmatpush3.bf16.msra.mxu1 %v1924_v24 }
 0x22f   : > { %v610_v25 = vpop.xlane.xlu0 %609 }
 0x230   : > { %v608_v43 = vpop.xlane.xlu1 %607  ;;  %v668_v51 = vmul.f32 0.0078125, %v610_v25 }
 0x231   : > { %v667_v29 = vmul.f32 0.0078125, %v608_v43 }
 0x232   : > { %v692_v38 = vmul.f32 %v668_v51, %v668_v51  ;;  %v728_v17 = vsub.f32 %v2462_v26, %v668_v51  ;;  %v2648_v26 = vld [vmem:[%s2924_s4 + $0x4] ss:$0 sm:$0xff] }
 0x233   : > { %v691_v30 = vmul.f32 %v667_v29, %v667_v29  ;;  %v644_v31 = vpop.xlane.xlu0 %643  ;;  %v727_v9 = vsub.f32 %v2465_v44, %v667_v29  ;;  %v2639_v44 = vld [vmem:[%s2924_s4 + $0x3] ss:$0 sm:$0xff] }
 0x234   : > { %v679_v34 = vmul.f32 0.0078125, %v644_v31  ;;  %v646_v35 = vpop.xlane.xlu1 %645 }
 0x235   : > { %v680_v39 = vmul.f32 0.0078125, %v646_v35 }
 0x236   : > { %v703_v42 = vsub.f32 %v679_v34, %v691_v30 }
 0x237   : > { %v704_v45 = vsub.f32 %v680_v39, %v692_v38 }
 0x238   : > { %v715_v48 = vmax.f32 %v703_v42, 0.0  ;;  %v614_v49 = vpop.xlane.xlu1 %613  ;;  %v612_v50 = vpop.xlane.xlu0 %611 }
 0x239   : > { %v716_v52 = vmax.f32 %v704_v45, 0.0  ;;  %v2618_v53 = vmul.f32 0.0078125, %v614_v49  ;;  %v2620_v54 = vmul.f32 0.0078125, %v612_v50 }
 0x23a   : > { %v739_v55 = vadd.f32 1e-05, %v715_v48 }
 0x23b   : > { %v740_v56 = vadd.f32 1e-05, %v716_v52  ;;  %v694_v57 = vmul.f32 %v2618_v53, %v2618_v53  ;;  %v693_v60 = vmul.f32 %v2620_v54, %v2620_v54 }
 0x23c   : > { %1998 = vrsqrt.f32 %v739_v55  ;;  %v650_v58 = vpop.xlane.xlu1 %649  ;;  %v648_v59 = vpop.xlane.xlu0 %647  ;;  %v730_v55 = vsub.f32 %v2472_v27, %v2618_v53 }
 0x23d   : > { %2000 = vrsqrt.f32 %v740_v56  ;;  %v682_v61 = vmul.f32 0.0078125, %v650_v58  ;;  %v681_v62 = vmul.f32 0.0078125, %v648_v59 }
 0x23f   : > { %v706_v63 = vsub.f32 %v682_v61, %v694_v57  ;;  %v705_v0 = vsub.f32 %v681_v62, %v693_v60  ;;  %v729_v62 = vsub.f32 %v2474_v28, %v2620_v54 }
 0x240   : > { %v618_v1 = vpop.xlane.xlu1 %617  ;;  %v616_v2 = vpop.xlane.xlu0 %615 }
 0x241   : > { %v718_v3 = vmax.f32 %v706_v63, 0.0  ;;  %v717_v4 = vmax.f32 %v705_v0, 0.0  ;;  %v2626_v5 = vmul.f32 0.0078125, %v618_v1  ;;  %v2628_v6 = vmul.f32 0.0078125, %v616_v2 }
 0x243   : > { %v742_v7 = vadd.f32 1e-05, %v718_v3  ;;  %v741_v8 = vadd.f32 1e-05, %v717_v4  ;;  %v696_v10 = vmul.f32 %v2626_v5, %v2626_v5  ;;  %v695_v13 = vmul.f32 %v2628_v6, %v2628_v6 }
 0x244   : > { %v654_v11 = vpop.xlane.xlu1 %653  ;;  %v652_v12 = vpop.xlane.xlu0 %651 }
 0x245   : > { %2002 = vrsqrt.f32 %v742_v7  ;;  %v684_v14 = vmul.f32 0.0078125, %v654_v11  ;;  %v683_v15 = vmul.f32 0.0078125, %v652_v12 }
 0x246   : > { %v1999_v16 = vpop.eup %1998  ;;  %2004 = vrsqrt.f32 %v741_v8 }
 0x247   : > { %v2001_v18 = vpop.eup %2000  ;;  %v708_v19 = vsub.f32 %v684_v14, %v696_v10  ;;  %v707_v20 = vsub.f32 %v683_v15, %v695_v13  ;;  %v763_v21 = vmul.f32 %v1999_v16, %v727_v9  ;;  %v732_v16 = vsub.f32 %v2486_v32, %v2626_v5 }
 0x248   : > { %v764_v22 = vmul.f32 %v2001_v18, %v728_v17  ;;  %v622_v23 = vpop.xlane.xlu1 %621  ;;  %v620_v24 = vpop.xlane.xlu0 %619 }
 0x249   : > { %v720_v25 = vmax.f32 %v708_v19, 0.0  ;;  %v719_v43 = vmax.f32 %v707_v20, 0.0  ;;  %v2641_v29 = vmul.f32 0.0078125, %v622_v23  ;;  %v2643_v30 = vmul.f32 0.0078125, %v620_v24 }
 0x24a   : > { %v779_v51 = vmul.f32 %v2639_v44, %v763_v21  ;;  %v780_v31 = vmul.f32 %v2639_v44, %v764_v22  ;;  %v731_v23 = vsub.f32 %v2488_v33, %v2628_v6 }
 0x24b   : > { %v744_v34 = vadd.f32 1e-05, %v720_v25  ;;  %v743_v35 = vadd.f32 1e-05, %v719_v43  ;;  %v698_v38 = vmul.f32 %v2641_v29, %v2641_v29  ;;  %v697_v49 = vmul.f32 %v2643_v30, %v2643_v30 }
 0x24c   : > { %v658_v39 = vpop.xlane.xlu1 %657  ;;  %v656_v42 = vpop.xlane.xlu0 %655  ;;  %v795_v45 = vadd.f32 %v2648_v26, %v779_v51  ;;  %v796_v48 = vadd.f32 %v2648_v26, %v780_v31 }
 0x24d   : > { %2006 = vrsqrt.f32 %v744_v34  ;;  %v686_v50 = vmul.f32 0.0078125, %v658_v39  ;;  %v685_v52 = vmul.f32 0.0078125, %v656_v42 }
 0x24e   : > { %2008 = vrsqrt.f32 %v743_v35  ;;  %v807_v56 = vmax.f32 %v795_v45, 0.0  ;;  %v808_v57 = vmax.f32 %v796_v48, 0.0 }
 0x24f   : > { %v2003_v58 = vpop.eup %2002  ;;  %v710_v59 = vsub.f32 %v686_v50, %v698_v38  ;;  %v709_v60 = vsub.f32 %v685_v52, %v697_v49 }
 0x250   : > { %v2005_v61 = vpop.eup %2004  ;;  %1810 = vmatprep.mubr.f32.mxu1 %v807_v56  ;;  %v626_v63 = vpop.xlane.xlu1 %625  ;;  %v766_v1 = vmul.f32 %v2003_v58, %v730_v55  ;;  %v734_v56 = vsub.f32 %v2496_v36, %v2641_v29 }
 0x251   : > { %v624_v0 = vpop.xlane.xlu0 %623  ;;  %v722_v2 = vmax.f32 %v710_v59, 0.0  ;;  %v721_v3 = vmax.f32 %v709_v60, 0.0  ;;  %v2662_v4 = vmul.f32 0.0078125, %v626_v63  ;;  %1811 = vmatmul.mubr.f32.vlgmr.msra.gmra.mrb[0].mxu1 %v808_v57  ;;  %v765_v27 = vmul.f32 %v2005_v61, %v729_v62 }
 0x252   : > { %v2664_v7 = vmul.f32 0.0078125, %v624_v0  ;;  %v782_v53 = vmul.f32 %v2639_v44, %v766_v1  ;;  %v733_v59 = vsub.f32 %v2498_v37, %v2643_v30 }
 0x253   : > { %v746_v8 = vadd.f32 1e-05, %v722_v2  ;;  %v745_v9 = vadd.f32 1e-05, %v721_v3  ;;  %v700_v10 = vmul.f32 %v2662_v4, %v2662_v4  ;;  %v781_v11 = vmul.f32 %v2639_v44, %v765_v27 }
 0x254   : > { %v662_v28 = vpop.xlane.xlu1 %661  ;;  %v798_v12 = vadd.f32 %v2648_v26, %v782_v53  ;;  %v699_v13 = vmul.f32 %v2664_v7, %v2664_v7  ;;  %v736_v30 = vsub.f32 %v2506_v40, %v2662_v4 }
 0x255   : > { %v660_v54 = vpop.xlane.xlu0 %659  ;;  %2010 = vrsqrt.f32 %v746_v8  ;;  %v688_v14 = vmul.f32 0.0078125, %v662_v28  ;;  %v797_v17 = vadd.f32 %v2648_v26, %v781_v11 }
 0x256   : > { %v687_v15 = vmul.f32 0.0078125, %v660_v54  ;;  %2012 = vrsqrt.f32 %v745_v9  ;;  %v810_v21 = vmax.f32 %v798_v12, 0.0  ;;  %v735_v54 = vsub.f32 %v2508_v41, %v2664_v7 }
 0x257   : > { %v2007_v18 = vpop.eup %2006  ;;  %v712_v19 = vsub.f32 %v688_v14, %v700_v10  ;;  %v809_v43 = vmax.f32 %v797_v17, 0.0 }
 0x258   : > { %v711_v20 = vsub.f32 %v687_v15, %v699_v13  ;;  %v2009_v22 = vpop.eup %2008  ;;  %v630_v24 = vpop.xlane.xlu1 %629  ;;  %v768_v51 = vmul.f32 %v2007_v18, %v732_v16 }
 0x259   : > { %v628_v25 = vpop.xlane.xlu0 %627  ;;  %v724_v31 = vmax.f32 %v712_v19, 0.0  ;;  %v678_v35 = vmul.f32 0.0078125, %v630_v24  ;;  %1813 = vmatprep.mubr.f32.mxu1 %v809_v43  ;;  %v767_v32 = vmul.f32 %v2009_v22, %v731_v23 }
 0x25a   : > { %v723_v34 = vmax.f32 %v711_v20, 0.0  ;;  %v2678_v38 = vmul.f32 0.0078125, %v628_v25  ;;  %v784_v5 = vmul.f32 %v2639_v44, %v768_v51  ;;  %1814 = vmatmul.mubr.f32.gmra.mrb[2].mxu1 %v810_v21 }
 0x25b   : > { %v748_v39 = vadd.f32 1e-05, %v724_v31  ;;  %v702_v45 = vmul.f32 %v678_v35, %v678_v35  ;;  %v783_v33 = vmul.f32 %v2639_v44, %v767_v32  ;;  %v738_v4 = vsub.f32 %v2516_v46, %v678_v35 }
 0x25c   : > { %v747_v42 = vadd.f32 1e-05, %v723_v34  ;;  %v666_v48 = vpop.xlane.xlu1 %665  ;;  %v800_v6 = vadd.f32 %v2648_v26, %v784_v5  ;;  %v701_v50 = vmul.f32 %v2678_v38, %v2678_v38  ;;  %v737_v41 = vsub.f32 %v2518_v47, %v2678_v38 }
 0x25d   : > { %v664_v49 = vpop.xlane.xlu0 %663  ;;  %2014 = vrsqrt.f32 %v748_v39  ;;  %v690_v52 = vmul.f32 0.0078125, %v666_v48  ;;  %v799_v57 = vadd.f32 %v2648_v26, %v783_v33 }
 0x25e   : > { %v689_v55 = vmul.f32 0.0078125, %v664_v49  ;;  %2016 = vrsqrt.f32 %v747_v42  ;;  %v812_v62 = vmax.f32 %v800_v6, 0.0 }
 0x25f   : > { %v2011_v58 = vpop.eup %2010  ;;  %v714_v60 = vsub.f32 %v690_v52, %v702_v45  ;;  %v811_v0 = vmax.f32 %v799_v57, 0.0 }
 0x260   : > { %v713_v61 = vsub.f32 %v689_v55, %v701_v50  ;;  %v2013_v63 = vpop.eup %2012  ;;  %v770_v1 = vmul.f32 %v2011_v58, %v734_v56 }
 0x261   : > { %v726_v2 = vmax.f32 %v714_v60, 0.0  ;;  %v769_v27 = vmul.f32 %v2013_v63, %v733_v59  ;;  %1816 = vmatprep.mubr.f32.mxu1 %v811_v0 }
 0x262   : > { %v725_v3 = vmax.f32 %v713_v61, 0.0  ;;  %v786_v53 = vmul.f32 %v2639_v44, %v770_v1  ;;  %1817 = vmatmul.mubr.f32.gmra.mrb[4].mxu1 %v812_v62 }
 0x263   : > { %v750_v36 = vadd.f32 1e-05, %v726_v2  ;;  %v785_v8 = vmul.f32 %v2639_v44, %v769_v27 }
 0x264   : > { %v749_v29 = vadd.f32 1e-05, %v725_v3  ;;  %v802_v9 = vadd.f32 %v2648_v26, %v786_v53 }
 0x265   : > { %2018 = vrsqrt.f32 %v750_v36  ;;  %v801_v37 = vadd.f32 %v2648_v26, %v785_v8 }
 0x266   : > { %2020 = vrsqrt.f32 %v749_v29  ;;  %v814_v10 = vmax.f32 %v802_v9, 0.0 }
 0x267   : > { %v2015_v28 = vpop.eup %2014  ;;  %v813_v11 = vmax.f32 %v801_v37, 0.0 }
 0x268   : > { %v2017_v12 = vpop.eup %2016  ;;  %v772_v13 = vmul.f32 %v2015_v28, %v736_v30 }
 0x269   : > { %1819 = vmatprep.mubr.f32.mxu1 %v813_v11  ;;  %v771_v14 = vmul.f32 %v2017_v12, %v735_v54 }
 0x26a   : > { %1820 = vmatmul.mubr.f32.gmra.mrb[6].mxu1 %v814_v10  ;;  %v788_v15 = vmul.f32 %v2639_v44, %v772_v13 }
 0x26b   : > { %v787_v16 = vmul.f32 %v2639_v44, %v771_v14 }
 0x26c   : > { %v804_v17 = vadd.f32 %v2648_v26, %v788_v15 }
 0x26d   : > { %v803_v40 = vadd.f32 %v2648_v26, %v787_v16 }
 0x26e   : > { %v816_v18 = vmax.f32 %v804_v17, 0.0 }
 0x26f   : > { %v2019_v19 = vpop.eup %2018  ;;  %v815_v7 = vmax.f32 %v803_v40, 0.0 }
 0x270   : > { %v2021_v20 = vpop.eup %2020  ;;  %v774_v21 = vmul.f32 %v2019_v19, %v738_v4 }
 0x271   : > { %1822 = vmatprep.mubr.f32.mxu1 %v815_v7  ;;  %v773_v22 = vmul.f32 %v2021_v20, %v737_v41 }
 0x272   : > { %1823 = vmatmul.mubr.f32.gmra.mrb[8].mxu1 %v816_v18  ;;  %v790_v23 = vmul.f32 %v2639_v44, %v774_v21 }
 0x273   : > { %v789_v24 = vmul.f32 %v2639_v44, %v773_v22 }
 0x274   : > { %v806_v25 = vadd.f32 %v2648_v26, %v790_v23 }
 0x275   : > { %v805_v43 = vadd.f32 %v2648_v26, %v789_v24 }
 0x276   : > { %v818_v46 = vmax.f32 %v806_v25, 0.0 }
 0x277   : > { %v817_v51 = vmax.f32 %v805_v43, 0.0 }
 0x279   : > { %1825 = vmatprep.mubr.f32.mxu1 %v817_v51 }
 0x27a   : > { %1826 = vmatmul.mubr.f32.gmra.mrb[10].mxu1 %v818_v46 }
 0x324   : > { %v2709_v31 = vpop.f32.mrb[0].mxu1 }
 0x325   : > { %1229 = vadd.xlane.f32.xlu1 %v2709_v31  ;;  %v2712_v47 = vpop.f32.mrb[1].mxu1  ;;  %v1252_v34 = vmul.f32 %v2709_v31, %v2709_v31 }
 0x326   : > { %1227 = vadd.xlane.f32.xlu0 %v2712_v47  ;;  %v1251_v44 = vmul.f32 %v2712_v47, %v2712_v47 }
 0x329   : > { %1265 = vadd.xlane.f32.xlu1 %v1252_v34  ;;  %v2786_v34 = vld [vmem:[%s2924_s4 + $0x5] ss:$0 sm:$0xff] }
 0x32a   : > { %1263 = vadd.xlane.f32.xlu0 %v1251_v44 }
 0x32d   : > { %v2719_v26 = vpop.f32.mrb[2].mxu1 }
 0x32e   : > { %1233 = vadd.xlane.f32.xlu1 %v2719_v26  ;;  %v2722_v35 = vpop.f32.mrb[3].mxu1  ;;  %v1254_v38 = vmul.f32 %v2719_v26, %v2719_v26 }
 0x32f   : > { %1231 = vadd.xlane.f32.xlu0 %v2722_v35  ;;  %v1253_v32 = vmul.f32 %v2722_v35, %v2722_v35 }
 0x332   : > { %1269 = vadd.xlane.f32.xlu1 %v1254_v38 }
 0x333   : > { %1267 = vadd.xlane.f32.xlu0 %v1253_v32 }
 0x335   : > { %v2729_v5 = vpop.f32.mrb[4].mxu1 }
 0x336   : > { %1237 = vadd.xlane.f32.xlu1 %v2729_v5  ;;  %v2732_v39 = vpop.f32.mrb[5].mxu1  ;;  %v1256_v42 = vmul.f32 %v2729_v5, %v2729_v5 }
 0x337   : > { %1235 = vadd.xlane.f32.xlu0 %v2732_v39  ;;  %v1255_v45 = vmul.f32 %v2732_v39, %v2732_v39 }
 0x33a   : > { %1273 = vadd.xlane.f32.xlu1 %v1256_v42 }
 0x33b   : > { %1271 = vadd.xlane.f32.xlu0 %v1255_v45 }
 0x33d   : > { %v2739_v48 = vpop.f32.mrb[6].mxu1 }
 0x33e   : > { %v2741_v49 = vpop.f32.mrb[7].mxu1  ;;  %1241 = vadd.xlane.f32.xlu1 %v2739_v48  ;;  %v1258_v33 = vmul.f32 %v2739_v48, %v2739_v48 }
 0x33f   : > { %1239 = vadd.xlane.f32.xlu0 %v2741_v49  ;;  %v1257_v6 = vmul.f32 %v2741_v49, %v2741_v49 }
 0x342   : > { %1277 = vadd.xlane.f32.xlu1 %v1258_v33 }
 0x343   : > { %1275 = vadd.xlane.f32.xlu0 %v1257_v6 }
 0x345   : > { %v2749_v50 = vpop.f32.mrb[8].mxu1 }
 0x346   : > { %v2751_v52 = vpop.f32.mrb[9].mxu1  ;;  %1245 = vadd.xlane.f32.xlu1 %v2749_v50  ;;  %v1260_v55 = vmul.f32 %v2749_v50, %v2749_v50 }
 0x347   : > { %1243 = vadd.xlane.f32.xlu0 %v2751_v52  ;;  %v1259_v56 = vmul.f32 %v2751_v52, %v2751_v52 }
 0x34a   : > { %1281 = vadd.xlane.f32.xlu1 %v1260_v55 }
 0x34b   : > { %1279 = vadd.xlane.f32.xlu0 %v1259_v56 }
 0x34d   : > { %v2759_v57 = vpop.f32.mrb[10].mxu1 }
 0x34e   : > { %v2761_v58 = vpop.f32.mrb[11].mxu1  ;;  %1249 = vadd.xlane.f32.xlu1 %v2759_v57  ;;  %v1262_v59 = vmul.f32 %v2759_v57, %v2759_v57 }
 0x34f   : > { %1247 = vadd.xlane.f32.xlu0 %v2761_v58  ;;  %v1261_v60 = vmul.f32 %v2761_v58, %v2761_v58 }
 0x352   : > { %1285 = vadd.xlane.f32.xlu1 %v1262_v59 }
 0x353   : > { %1283 = vadd.xlane.f32.xlu0 %v1261_v60 }
 0x3b2   : > { %v1230_v61 = vpop.xlane.xlu1 %1229 }
 0x3b3   : > { %v1288_v62 = vmul.f32 0.0078125, %v1230_v61  ;;  %v1228_v63 = vpop.xlane.xlu0 %1227 }
 0x3b4   : > { %v1287_v0 = vmul.f32 0.0078125, %v1228_v63 }
 0x3b5   : > { %v1312_v2 = vmul.f32 %v1288_v62, %v1288_v62  ;;  %v1348_v24 = vsub.f32 %v2709_v31, %v1288_v62 }
 0x3b6   : > { %v1266_v1 = vpop.xlane.xlu1 %1265  ;;  %v1311_v53 = vmul.f32 %v1287_v0, %v1287_v0  ;;  %v1347_v51 = vsub.f32 %v2712_v47, %v1287_v0  ;;  %v2796_v47 = vld [vmem:[%s2924_s4 + $0x6] ss:$0 sm:$0xff] }
 0x3b7   : > { %v1300_v3 = vmul.f32 0.0078125, %v1266_v1  ;;  %v1264_v27 = vpop.xlane.xlu0 %1263 }
 0x3b8   : > { %v1299_v36 = vmul.f32 0.0078125, %v1264_v27 }
 0x3b9   : > { %v1324_v29 = vsub.f32 %v1300_v3, %v1312_v2 }
 0x3ba   : > { %v1323_v8 = vsub.f32 %v1299_v36, %v1311_v53 }
 0x3bb   : > { %v1336_v9 = vmax.f32 %v1324_v29, 0.0  ;;  %v1234_v30 = vpop.xlane.xlu1 %1233 }
 0x3bc   : > { %v1335_v37 = vmax.f32 %v1323_v8, 0.0  ;;  %v2769_v28 = vmul.f32 0.0078125, %v1234_v30  ;;  %v1232_v54 = vpop.xlane.xlu0 %1231 }
 0x3bd   : > { %v1360_v10 = vadd.f32 1e-05, %v1336_v9  ;;  %v2771_v12 = vmul.f32 0.0078125, %v1232_v54 }
 0x3be   : > { %v1359_v11 = vadd.f32 1e-05, %v1335_v37  ;;  %v1314_v14 = vmul.f32 %v2769_v28, %v2769_v28  ;;  %v1350_v54 = vsub.f32 %v2719_v26, %v2769_v28 }
 0x3bf   : > { %2022 = vrsqrt.f32 %v1360_v10  ;;  %v1270_v13 = vpop.xlane.xlu1 %1269  ;;  %v1313_v17 = vmul.f32 %v2771_v12, %v2771_v12 }
 0x3c0   : > { %2024 = vrsqrt.f32 %v1359_v11  ;;  %v1302_v15 = vmul.f32 0.0078125, %v1270_v13  ;;  %v1268_v16 = vpop.xlane.xlu0 %1267 }
 0x3c1   : > { %v1301_v40 = vmul.f32 0.0078125, %v1268_v16 }
 0x3c2   : > { %v1326_v4 = vsub.f32 %v1302_v15, %v1314_v14  ;;  %v1349_v15 = vsub.f32 %v2722_v35, %v2771_v12 }
 0x3c3   : > { %v1325_v18 = vsub.f32 %v1301_v40, %v1313_v17  ;;  %v1238_v19 = vpop.xlane.xlu1 %1237 }
 0x3c4   : > { %v1338_v41 = vmax.f32 %v1326_v4, 0.0  ;;  %v2777_v7 = vmul.f32 0.0078125, %v1238_v19  ;;  %v1236_v20 = vpop.xlane.xlu0 %1235 }
 0x3c5   : > { %v1337_v21 = vmax.f32 %v1325_v18, 0.0  ;;  %v2779_v22 = vmul.f32 0.0078125, %v1236_v20 }
 0x3c6   : > { %v1362_v23 = vadd.f32 1e-05, %v1338_v41  ;;  %v1316_v44 = vmul.f32 %v2777_v7, %v2777_v7  ;;  %v1352_v12 = vsub.f32 %v2729_v5, %v2777_v7 }
 0x3c7   : > { %v1361_v25 = vadd.f32 1e-05, %v1337_v21  ;;  %v1274_v43 = vpop.xlane.xlu1 %1273  ;;  %v1315_v31 = vmul.f32 %v2779_v22, %v2779_v22  ;;  %v1351_v7 = vsub.f32 %v2732_v39, %v2779_v22 }
 0x3c8   : > { %2026 = vrsqrt.f32 %v1362_v23  ;;  %v1304_v38 = vmul.f32 0.0078125, %v1274_v43  ;;  %v1272_v32 = vpop.xlane.xlu0 %1271 }
 0x3c9   : > { %v2023_v46 = vpop.eup %2022  ;;  %2028 = vrsqrt.f32 %v1361_v25  ;;  %v1303_v33 = vmul.f32 0.0078125, %v1272_v32 }
 0x3ca   : > { %v2025_v42 = vpop.eup %2024  ;;  %v1384_v45 = vmul.f32 %v2023_v46, %v1348_v24  ;;  %v1328_v55 = vsub.f32 %v1304_v38, %v1316_v44 }
 0x3cb   : > { %v1383_v6 = vmul.f32 %v2025_v42, %v1347_v51  ;;  %v1327_v59 = vsub.f32 %v1303_v33, %v1315_v31  ;;  %v1242_v60 = vpop.xlane.xlu1 %1241 }
 0x3cc   : > { %v1400_v56 = vmul.f32 %v2786_v34, %v1384_v45  ;;  %v1340_v62 = vmax.f32 %v1328_v55, 0.0  ;;  %v2800_v63 = vmul.f32 0.0078125, %v1242_v60  ;;  %v1240_v0 = vpop.xlane.xlu0 %1239 }
 0x3cd   : > { %v1399_v61 = vmul.f32 %v2786_v34, %v1383_v6  ;;  %v1339_v2 = vmax.f32 %v1327_v59, 0.0  ;;  %v2803_v3 = vmul.f32 0.0078125, %v1240_v0 }
 0x3ce   : > { %v1416_v1 = vadd.f32 %v2796_v47, %v1400_v56  ;;  %v1364_v53 = vadd.f32 1e-05, %v1340_v62  ;;  %v1318_v37 = vmul.f32 %v2800_v63, %v2800_v63  ;;  %v1354_v22 = vsub.f32 %v2739_v48, %v2800_v63 }
 0x3cf   : > { %v1415_v27 = vadd.f32 %v2796_v47, %v1399_v61  ;;  %v1363_v29 = vadd.f32 1e-05, %v1339_v2  ;;  %v1278_v8 = vpop.xlane.xlu1 %1277  ;;  %v1317_v11 = vmul.f32 %v2803_v3, %v2803_v3 }
 0x3d0   : > { %v1428_v36 = vmax.f32 %v1416_v1, 0.0  ;;  %2030 = vrsqrt.f32 %v1364_v53  ;;  %v1306_v30 = vmul.f32 0.0078125, %v1278_v8  ;;  %v1276_v10 = vpop.xlane.xlu0 %1275 }
 0x3d1   : > { %v1427_v9 = vmax.f32 %v1415_v27, 0.0  ;;  %2032 = vrsqrt.f32 %v1363_v29  ;;  %v1305_v13 = vmul.f32 0.0078125, %v1276_v10 }
 0x3d2   : > { %1440 = vst [vmem:[%s2808_s17 + $0x8] sm:$0xff] %v1428_v36  ;;  %v2027_v14 = vpop.eup %2026  ;;  %v1330_v16 = vsub.f32 %v1306_v30, %v1318_v37 }
 0x3d3   : > { %1439 = vst [vmem:[%s2808_s17] sm:$0xff] %v1427_v9  ;;  %v2029_v17 = vpop.eup %2028  ;;  %v1386_v40 = vmul.f32 %v2027_v14, %v1350_v54  ;;  %v1329_v4 = vsub.f32 %v1305_v13, %v1317_v11  ;;  %v1246_v18 = vpop.xlane.xlu1 %1245 }
 0x3d4   : > { %v1385_v19 = vmul.f32 %v2029_v17, %v1349_v15  ;;  %v1342_v41 = vmax.f32 %v1330_v16, 0.0  ;;  %v2818_v20 = vmul.f32 0.0078125, %v1246_v18  ;;  %v1244_v26 = vpop.xlane.xlu0 %1243  ;;  %v1353_v17 = vsub.f32 %v2741_v49, %v2803_v3 }
 0x3d5   : > { %v1402_v28 = vmul.f32 %v2786_v34, %v1386_v40  ;;  %v1341_v21 = vmax.f32 %v1329_v4, 0.0  ;;  %v2821_v23 = vmul.f32 0.0078125, %v1244_v26 }
 0x3d6   : > { %v1401_v24 = vmul.f32 %v2786_v34, %v1385_v19  ;;  %v1366_v25 = vadd.f32 1e-05, %v1342_v41  ;;  %v1320_v44 = vmul.f32 %v2818_v20, %v2818_v20 }
 0x3d7   : > { %v1418_v35 = vadd.f32 %v2796_v47, %v1402_v28  ;;  %v1365_v43 = vadd.f32 1e-05, %v1341_v21  ;;  %v1282_v46 = vpop.xlane.xlu1 %1281  ;;  %v1319_v45 = vmul.f32 %v2821_v23, %v2821_v23 }
 0x3d8   : > { %v1417_v51 = vadd.f32 %v2796_v47, %v1401_v24  ;;  %2034 = vrsqrt.f32 %v1366_v25  ;;  %v1308_v38 = vmul.f32 0.0078125, %v1282_v46  ;;  %v1280_v32 = vpop.xlane.xlu0 %1279  ;;  %v1355_v46 = vsub.f32 %v2751_v52, %v2821_v23 }
 0x3d9   : > { %v1430_v42 = vmax.f32 %v1418_v35, 0.0  ;;  %2036 = vrsqrt.f32 %v1365_v43  ;;  %v1307_v31 = vmul.f32 0.0078125, %v1280_v32  ;;  %v1356_v35 = vsub.f32 %v2749_v50, %v2818_v20 }
 0x3da   : > { %v2031_v33 = vpop.eup %2030  ;;  %v1429_v5 = vmax.f32 %v1417_v51, 0.0  ;;  %v1332_v6 = vsub.f32 %v1308_v38, %v1320_v44 }
 0x3db   : > { %v2033_v55 = vpop.eup %2032  ;;  %1442 = vst [vmem:[%s2808_s17 + $0x18] sm:$0xff] %v1430_v42  ;;  %v1388_v56 = vmul.f32 %v2031_v33, %v1352_v12  ;;  %v1331_v59 = vsub.f32 %v1307_v31, %v1319_v45  ;;  %v1250_v60 = vpop.xlane.xlu1 %1249 }
 0x3dc   : > { %1441 = vst [vmem:[%s2808_s17 + $0x10] sm:$0xff] %v1429_v5  ;;  %v1387_v61 = vmul.f32 %v2033_v55, %v1351_v7  ;;  %v1344_v62 = vmax.f32 %v1332_v6, 0.0  ;;  %v1298_v0 = vmul.f32 0.0078125, %v1250_v60  ;;  %v1248_v1 = vpop.xlane.xlu0 %1247 }
 0x3dd   : > { %v1404_v2 = vmul.f32 %v2786_v34, %v1388_v56  ;;  %v1343_v27 = vmax.f32 %v1331_v59, 0.0  ;;  %v1297_v53 = vmul.f32 0.0078125, %v1248_v1 }
 0x3de   : > { %v1403_v36 = vmul.f32 %v2786_v34, %v1387_v61  ;;  %v1368_v29 = vadd.f32 1e-05, %v1344_v62  ;;  %v1322_v30 = vmul.f32 %v1298_v0, %v1298_v0  ;;  %v1358_v52 = vsub.f32 %v2759_v57, %v1298_v0 }
 0x3df   : > { %v1420_v39 = vadd.f32 %v2796_v47, %v1404_v2  ;;  %v1367_v8 = vadd.f32 1e-05, %v1343_v27  ;;  %v1286_v9 = vpop.xlane.xlu1 %1285  ;;  %v1321_v13 = vmul.f32 %v1297_v53, %v1297_v53  ;;  %v1357_v33 = vsub.f32 %v2761_v58, %v1297_v53 }
 0x3e0   : > { %v1419_v37 = vadd.f32 %v2796_v47, %v1403_v36  ;;  %2038 = vrsqrt.f32 %v1368_v29  ;;  %v1310_v10 = vmul.f32 0.0078125, %v1286_v9  ;;  %v1284_v54 = vpop.xlane.xlu0 %1283 }
 0x3e1   : > { %v1432_v11 = vmax.f32 %v1420_v39, 0.0  ;;  %2040 = vrsqrt.f32 %v1367_v8  ;;  %v1309_v14 = vmul.f32 0.0078125, %v1284_v54 }
 0x3e2   : > { %v2035_v15 = vpop.eup %2034  ;;  %v1431_v16 = vmax.f32 %v1419_v37, 0.0  ;;  %v1334_v48 = vsub.f32 %v1310_v10, %v1322_v30 }
 0x3e3   : > { %v2037_v63 = vpop.eup %2036  ;;  %1444 = vst [vmem:[%s2808_s17 + $0x28] sm:$0xff] %v1432_v11  ;;  %v1390_v40 = vmul.f32 %v2035_v15, %v1354_v22  ;;  %v1333_v4 = vsub.f32 %v1309_v14, %v1321_v13 }
 0x3e4   : > { %1443 = vst [vmem:[%s2808_s17 + $0x20] sm:$0xff] %v1431_v16  ;;  %v1389_v18 = vmul.f32 %v2037_v63, %v1353_v17  ;;  %v1346_v19 = vmax.f32 %v1334_v48, 0.0 }
 0x3e5   : > { %v1406_v41 = vmul.f32 %v2786_v34, %v1390_v40  ;;  %v1345_v26 = vmax.f32 %v1333_v4, 0.0 }
 0x3e6   : > { %v1405_v28 = vmul.f32 %v2786_v34, %v1389_v18  ;;  %v1370_v21 = vadd.f32 1e-05, %v1346_v19 }
 0x3e7   : > { %v1422_v24 = vadd.f32 %v2796_v47, %v1406_v41  ;;  %v1369_v25 = vadd.f32 1e-05, %v1345_v26 }
 0x3e8   : > { %v1421_v49 = vadd.f32 %v2796_v47, %v1405_v28  ;;  %2042 = vrsqrt.f32 %v1370_v21 }
 0x3e9   : > { %v1434_v3 = vmax.f32 %v1422_v24, 0.0  ;;  %2044 = vrsqrt.f32 %v1369_v25 }
 0x3ea   : > { %v2039_v12 = vpop.eup %2038  ;;  %v1433_v43 = vmax.f32 %v1421_v49, 0.0 }
 0x3eb   : > { %v2041_v51 = vpop.eup %2040  ;;  %1446 = vst [vmem:[%s2808_s17 + $0x38] sm:$0xff] %v1434_v3  ;;  %v1392_v44 = vmul.f32 %v2039_v12, %v1356_v35 }
 0x3ec   : > { %1445 = vst [vmem:[%s2808_s17 + $0x30] sm:$0xff] %v1433_v43  ;;  %v1391_v38 = vmul.f32 %v2041_v51, %v1355_v46 }
 0x3ed   : > { %v1408_v32 = vmul.f32 %v2786_v34, %v1392_v44 }
 0x3ee   : > { %v1407_v42 = vmul.f32 %v2786_v34, %v1391_v38 }
 0x3ef   : > { %v1424_v50 = vadd.f32 %v2796_v47, %v1408_v32 }
 0x3f0   : > { %v1423_v20 = vadd.f32 %v2796_v47, %v1407_v42 }
 0x3f1   : > { %v1436_v45 = vmax.f32 %v1424_v50, 0.0 }
 0x3f2   : > { %v2043_v23 = vpop.eup %2042  ;;  %v1435_v31 = vmax.f32 %v1423_v20, 0.0 }
 0x3f3   : > { %v2045_v5 = vpop.eup %2044  ;;  %1448 = vst [vmem:[%s2808_s17 + $0x48] sm:$0xff] %v1436_v45  ;;  %v1394_v7 = vmul.f32 %v2043_v23, %v1358_v52 }
 0x3f4   : > { %1447 = vst [vmem:[%s2808_s17 + $0x40] sm:$0xff] %v1435_v31  ;;  %v1393_v6 = vmul.f32 %v2045_v5, %v1357_v33 }
 0x3f5   : > { %v1410_v55 = vmul.f32 %v2786_v34, %v1394_v7 }
 0x3f6   : > { %v1409_v56 = vmul.f32 %v2786_v34, %v1393_v6 }
 0x3f7   : > { %v1426_v57 = vadd.f32 %v2796_v47, %v1410_v55 }
 0x3f8   : > { %v1425_v59 = vadd.f32 %v2796_v47, %v1409_v56 }
 0x3f9   : > { %v1438_v58 = vmax.f32 %v1426_v57, 0.0 }
 0x3fa   : > { %v1437_v60 = vmax.f32 %v1425_v59, 0.0 }
 0x3fb   : > { %1450 = vst [vmem:[%s2808_s17 + $0x58] sm:$0xff] %v1438_v58 }
 0x3fc   : > { %1449 = vst [vmem:[%s2808_s17 + $0x50] sm:$0xff] %v1437_v60 }
 0x3fd   : > { %2089 = shalt.err (!%p2086_p3)
}
 0x3fe   : > { %s2090_s28 = scalar_lea.hbm %s2873_s15, 1536  ;;  %s2094_s11 = scalar_lea.hbm %s2925_s5, 4608 }
 0x3ff   : > { %p2091_p4 = scmp.ne.s32.totalorder %s2873_s15, %s2090_s28  ;;  %p2095_p2 = scmp.lt.u32.totalorder %s2873_s15, %s2925_s5 }
 0x400   : > { %p2096_p7 = scmp.lt.u32.totalorder %s2094_s11, %s2090_s28  ;;  %p2098_p6 = scmp.lt.u32.totalorder %s2090_s28, %s2873_s15 }
 0x401   : > { %p2092_p5 = pnand %p2091_p4, %p2932_p11 }
 0x402   : > { %p2097_p10 = por %p2096_p7, %p2095_p2 }
 0x403   : > { %p2093_p0 = pneg %p2092_p5 }
 0x404   : > { %p2099_p12 = por %p2098_p6, %p2097_p10 }
 0x406   : > { %p2100_p8 = pnand %p2099_p12, %p2093_p0 }
 0x408   : > { %2103 = shalt.err (!%p2100_p8)
}
 0x409   : > { %s2150_s25 = smov 128   ;;  %s2151_s12 = smov 8  }
 0x40a   : > { %1943 = dma.vmem_to_hbm [thread:$0]  (%p2932_p11), %s2875_s26, 1536, %s2873_s15, %s1452_s22, %s2150_s25, %s2150_s25, %s2151_s12  }
 0x40b PF: > { %p1954_p9 = scmp.ge.s32.totalorder %s2142_s21, 2  ;;  %s1480_s14 = sand.u32 1, %s2130_s18  }
 0x40c   : > { %p2933_p13 = scmp.ne.s32.totalorder %s2930_s6, 0  ;;  %s1481_s8 = scalar_lea.sflag [#allocation4], %s1480_s14 }
 0x40e   : > { %p1950_p1 = pnand %p1954_p9, %p2933_p13 }
 0x410   : > { %2125 = dma.done.wait (!%p1950_p1), %s1481_s8, 1536  }
 0x411   : > { %2127 = vsyncadd (!%p1950_p1), %s1481_s8, 4294965760  ;;  %p18_p3 = scmp.ge.s32.totalorder %s2207_s24, 5   ;;  %s2934_s18 = smov %s2134_s19 }
 0x412   : > { %s2935_s19 = smov %s2138_s20  ;;  %s2936_s20 = smov %s2219_s27 }
 0x413   : > { %s2937_s21 = smov %s2207_s24  ;;  %20 = sbr.rel (!%p18_p3) target bundleno = 5 (0x5), region = 88 }
 0x41a   :  { %1486 = vsyncpa [#allocation3], 1 }
 0x41b   :  { %1488 = vsyncpa [#allocation3 + $0x1], 1 }
 0x41c   :  { %1489 = vsyncpa [#allocation4], 1 }
 0x41d   :  { %1491 = vsyncpa [#allocation4 + $0x1], 1 }

</bundles_post_ra>
